<compile_context>
chip_gen: v5e
topology: v5e:2x2
jax: 0.10.0
libtpu: 0.0.40
codegen_flags: <defaults>
</compile_context>

<pallas_src>
import functools

import numpy as np
import jax
import jax.numpy as jnp
from jax.experimental import pallas as pl
from jax.experimental.pallas import tpu as pltpu

ATT_NEG_SLOPE = 0.2    # GATConv attention LeakyReLU slope (PyG default)
RELU_NEG_SLOPE = 0.01  # nn.LeakyReLU() default negative_slope
LANE = 128
SCORE_COLS = 128       # lane-padded score columns: [src_0..src_{H-1}, dst_0..dst_{H-1}, 0, ...]


def _round_up(v, m):
    return (v + m - 1) // m * m


def _leaky(x, slope):
    return jnp.where(x >= 0, x, slope * x)


def _res_block_kernel(x_ref, adj_ref, scw_ref, scb_ref, w_ref, att_ref, b_ref,
                      o_ref, h0_scr, h1_scr, xp_scr, s_scr, sT_scr,
                      *, heads, fout, tm):
    layer = pl.program_id(0)                 # 0 -> conv1 pass, 1 -> conv2 pass
    r = pl.program_id(1)                     # dst-row tile index
    row = pl.multiple_of(r * tm, tm)
    f32 = jnp.float32

    # ---------------- per-layer setup (first row tile of each layer) ----------------
    def layer_setup(h_all):
        xp = jnp.dot(h_all, w_ref[...], preferred_element_type=f32)        # [N, CP]
        xp_scr[...] = xp
        # one matmul gives src+dst scores for every head (no per-head XLU reductions)
        s = jnp.dot(xp, att_ref[...], preferred_element_type=f32)          # [N, SCORE_COLS]
        s_scr[...] = s                                                      # node-major (dst side)
        sT_scr[...] = jnp.transpose(s)                                      # lane-major (src side), once per layer

    @pl.when(jnp.logical_and(layer == 0, r == 0))
    def _():
        # same_channel = nn.Linear(in_channel, out_channel)
        h0 = jnp.dot(x_ref[...], scw_ref[...], preferred_element_type=f32) + scb_ref[...]
        h0_scr[...] = h0
        layer_setup(h0)

    @pl.when(jnp.logical_and(layer == 1, r == 0))
    def _():
        layer_setup(h1_scr[...])

    # ---------------- attention for this (layer, dst-row tile) ----------------------
    mask = adj_ref[...].astype(f32) > 0.0     # int8 mask, evaluated once per tile
    xp_all = xp_scr[...]                      # [N, CP] transformed features of all src nodes
    s_dst = s_scr[pl.ds(row, tm), :]          # [TM, SCORE_COLS] dst-side scores of this tile
    cp = xp_all.shape[-1]
    cols = jax.lax.broadcasted_iota(jnp.int32, (1, cp), 1)
    neg = jnp.float32(-1e30)

    acc = jnp.zeros((tm, cp), f32)
    # heads is tiny & static; per-head temporaries are [TM, N] (bounded by row tiling).
    # TODO(synk): when heads*fout > 128, slice xp_all per head with lane-aligned pl.ds
    #             instead of masking the result columns (saves heads x MXU flops).
    for h in range(heads):
        a_dst = s_dst[:, heads + h:heads + h + 1]                           # [TM, 1]
        a_src = sT_scr[pl.ds(h, 1), :]                                      # [1, N] lane-oriented
        logits = _leaky(a_dst + a_src, ATT_NEG_SLOPE)
        logits = jnp.where(mask, logits, neg)
        m = jnp.max(logits, axis=-1, keepdims=True)
        p = jnp.where(mask, jnp.exp(logits - m), 0.0)
        denom = jnp.sum(p, axis=-1, keepdims=True)
        # EUP reciprocal; guarded so fully-masked (padded) dst rows give 0, not NaN.
        inv = jnp.where(denom > 0, pl.reciprocal(denom, approx=True), 0.0)
        alpha = p * inv
        head_sel = ((cols >= h * fout) & (cols < (h + 1) * fout)).astype(f32)
        # column masking commutes with the matmul -> mask the small [TM, CP] result
        acc = acc + jnp.dot(alpha, xp_all, preferred_element_type=f32) * head_sel
    out = acc + b_ref[...]

    @pl.when(layer == 0)
    def _():
        # relu1 output kept in VMEM scratch; o_ref deliberately NOT written in the
        # layer-0 pass (its block index is constant there, so no HBM writeback).
        h1_scr[pl.ds(row, tm), :] = _leaky(out, RELU_NEG_SLOPE)

    @pl.when(layer == 1)
    def _():
        o_ref[...] = (out + h0_scr[pl.ds(row, tm), :]).astype(o_ref.dtype)  # residual add


def res_encoding_block(x, adj, params, *, heads, fout, tm=128):
    """Fused ResEncodingBlock forward.

    x: [N, in_ch] float32, adj: [N, N] (nonzero => edge dst <- src, self-loops included).
    tm: dst-row tile size; size it to VMEM (halve on v7x's 64 MiB if needed).
    """
    n, in_ch = x.shape
    c = heads * fout
    cp = _round_up(c, LANE)
    icp = _round_up(in_ch, LANE)
    n_pad = _round_up(n, LANE)
    # pick a dst-row tile size that is a multiple of 8 and divides n_pad
    tm = max(8, min(int(tm) // 8 * 8, n_pad))
    while n_pad % tm:
        tm -= 8
    assert n_pad % tm == 0 and tm % 8 == 0
    assert 2 * heads <= SCORE_COLS

    f32 = jnp.float32
    # ---- pad / pack operands (lane-dense channels, int8 adjacency mask) ----
    x_p = jnp.zeros((n_pad, icp), f32).at[:n, :in_ch].set(x.astype(f32))
    adj_i8 = jnp.zeros((n_pad, n_pad), jnp.int8).at[:n, :n].set((adj != 0).astype(jnp.int8))

    scw = jnp.zeros((icp, cp), f32).at[:in_ch, :c].set(params["sc_w"])
    scb = jnp.zeros((1, cp), f32).at[0, :c].set(params["sc_b"])
    w_stack = jnp.zeros((2, cp, cp), f32).at[:, :c, :c].set(jnp.stack([params["w1"], params["w2"]]))
    b_stack = jnp.zeros((2, 1, cp), f32).at[:, 0, :c].set(jnp.stack([params["b1"], params["b2"]]))

    # att_cat[layer]: [CP, SCORE_COLS]; column h holds att_src[h], column heads+h holds
    # att_dst[h], each placed on that head's feature rows of the concat layout.
    att_np = np.zeros((2, cp, SCORE_COLS), np.float32)
    for li, (asrc, adst) in enumerate([(params["as1"], params["ad1"]),
                                       (params["as2"], params["ad2"])]):
        asrc = np.asarray(asrc)
        adst = np.asarray(adst)
        for h in range(heads):
            att_np[li, h * fout:(h + 1) * fout, h] = asrc[h]
            att_np[li, h * fout:(h + 1) * fout, heads + h] = adst[h]
    att_stack = jnp.asarray(att_np)

    grid = (2, n_pad // tm)

    in_specs = [
        pl.BlockSpec((n_pad, icp), lambda l, r: (0, 0)),                  # x (resident)
        pl.BlockSpec((tm, n_pad), lambda l, r: (r, 0)),                   # adj row tile (streamed int8)
        pl.BlockSpec((icp, cp), lambda l, r: (0, 0)),                     # same_channel W
        pl.BlockSpec((1, cp), lambda l, r: (0, 0)),                       # same_channel b
        pl.BlockSpec((None, cp, cp), lambda l, r: (l, 0, 0)),             # GAT W of current layer
        pl.BlockSpec((None, cp, SCORE_COLS), lambda l, r: (l, 0, 0)),     # att_cat of current layer
        pl.BlockSpec((None, 1, cp), lambda l, r: (l, 0, 0)),              # GAT bias of current layer
    ]
    # During layer 0 every step maps to output block 0 (never written there), so
    # Pallas issues no output writeback DMAs until the layer-1 pass: final output
    # rows hit HBM exactly once instead of twice.
    out_spec = pl.BlockSpec((tm, cp), lambda l, r: (l * r, 0))

    scratch_shapes = [
        pltpu.VMEM((n_pad, cp), f32),          # h0 (same_channel output == residual identity)
        pltpu.VMEM((n_pad, cp), f32),          # h1 (layer-1 output after LeakyReLU)
        pltpu.VMEM((n_pad, cp), f32),          # xp (current layer x @ W, all nodes)
        pltpu.VMEM((n_pad, SCORE_COLS), f32),  # scores, node-major (dst side)
        pltpu.VMEM((SCORE_COLS, n_pad), f32),  # scores, lane-major (src side)
    ]

    # Rough VMEM budget: double-buffered streamed blocks + resident blocks + scratch + temps.
    est = (2 * (tm * n_pad * 1 + tm * cp * 4 + (cp * cp + cp * SCORE_COLS + cp) * 4)
           + (n_pad * icp + icp * cp + cp) * 4
           + (3 * n_pad * cp + 2 * n_pad * SCORE_COLS) * 4
           + 6 * tm * n_pad * 4)
    vmem_limit = int(min(max(2 * est, 32 * 1024 * 1024), 48 * 1024 * 1024))

    kernel = functools.partial(_res_block_kernel, heads=heads, fout=fout, tm=tm)
    out_p = pl.pallas_call(
        kernel,
        grid=grid,
        in_specs=in_specs,
        out_specs=out_spec,
        out_shape=jax.ShapeDtypeStruct((n_pad, cp), f32),
        scratch_shapes=scratch_shapes,
        compiler_params=pltpu.CompilerParams(
            # Layer axis is a true dependence; the row axis also stays "arbitrary"
            # because layer-2 needs layer-1 results of ALL row tiles carried in
            # per-core VMEM scratch (split into two pallas_calls to make it
            # "parallel" for v7x's 2 TensorCores).
            dimension_semantics=("arbitrary", "arbitrary"),
            vmem_limit_bytes=vmem_limit,
        ),
    )(x_p, adj_i8, scw, scb, w_stack, att_stack, b_stack)
    return out_p[:n, :c]


# ----------------------------- pure-JAX reference --------------------------------
def _gat_ref(h, mask, w, att_src, att_dst, b, *, heads, fout):
    n = h.shape[0]
    xp = h @ w                                            # [N, H*F]
    xph = xp.reshape(n, heads, fout)
    a_src = jnp.einsum("nhf,hf->nh", xph, att_src)
    a_dst = jnp.einsum("nhf,hf->nh", xph, att_dst)
    outs = []
    for hh in range(heads):
        logits = _leaky(a_dst[:, hh:hh + 1] + a_src[:, hh][None, :], ATT_NEG_SLOPE)
        logits = jnp.where(mask, logits, -1e30)
        m = jnp.max(logits, axis=-1, keepdims=True)
        p = jnp.where(mask, jnp.exp(logits - m), 0.0)
        alpha = p / jnp.sum(p, axis=-1, keepdims=True)
        outs.append(alpha @ xph[:, hh, :])
    return jnp.concatenate(outs, axis=-1) + b


def reference(x, adj, params, *, heads, fout):
    mask = adj != 0
    h = x @ params["sc_w"] + params["sc_b"]
    identity = h
    h = _gat_ref(h, mask, params["w1"], params["as1"], params["ad1"], params["b1"],
                 heads=heads, fout=fout)
    h = _leaky(h, RELU_NEG_SLOPE)
    h = _gat_ref(h, mask, params["w2"], params["as2"], params["ad2"], params["b2"],
                 heads=heads, fout=fout)
    return h + identity


def init_params(key, in_ch, out_ch, heads):
    fout = out_ch // heads
    ks = jax.random.split(key, 10)

    def nrm(k, shape, scale=0.3):
        return scale * jax.random.normal(k, shape, dtype=jnp.float32)

    return {
        "sc_w": nrm(ks[0], (in_ch, out_ch)),   # same_channel: Linear(in_ch, out_ch), [in, out]
        "sc_b": nrm(ks[1], (out_ch,)),
        "w1": nrm(ks[2], (out_ch, out_ch)),    # conv1: GATConv(out_ch, out_ch//heads, heads)
        "as1": nrm(ks[3], (heads, fout)),
        "ad1": nrm(ks[4], (heads, fout)),
        "b1": nrm(ks[5], (out_ch,)),
        "w2": nrm(ks[6], (out_ch, out_ch)),    # conv2: GATConv(out_ch, out_ch//heads, heads)
        "as2": nrm(ks[7], (heads, fout)),
        "ad2": nrm(ks[8], (heads, fout)),
        "b2": nrm(ks[9], (out_ch,)),
    }


if __name__ == "__main__":
    N, E = 16, 40
    IN_CH, OUT_CH, HEADS = 4, 8, 2
    FOUT = OUT_CH // HEADS

    key = jax.random.PRNGKey(0)
    k_x, k_src, k_dst, k_p = jax.random.split(key, 4)

    x = jax.random.normal(k_x, (N, IN_CH), dtype=jnp.float32)
    src = jax.random.randint(k_src, (E,), 0, N)
    dst = jax.random.randint(k_dst, (E,), 0, N)
    edge_index = jnp.stack([src, dst])                    # [2, E] (row 0 = src, row 1 = dst)

    # Densify edge_index into an adjacency mask adj[dst, src]; add self-loops
    # (PyG GATConv add_self_loops=True default).  Duplicate edges are de-duplicated
    # by the dense mask.
    adj = jnp.zeros((N, N), jnp.int8).at[edge_index[1], edge_index[0]].set(1)
    adj = jnp.maximum(adj, jnp.eye(N, dtype=jnp.int8))

    params = init_params(k_p, IN_CH, OUT_CH, HEADS)

    # tm=32 at this toy size exercises the multi-tile (layer x row-tile) grid path,
    # including the layer-dependent output index_map.
    out = res_encoding_block(x, adj, params, heads=HEADS, fout=FOUT, tm=32)
    out = jax.block_until_ready(out)

    ref = reference(x, adj, params, heads=HEADS, fout=FOUT)
    # pl.reciprocal(approx=True) is used for the softmax denominator -> slightly
    # looser tolerance than exact-division parity (use approx=False for bit parity).
    np.testing.assert_allclose(np.asarray(out), np.asarray(ref), rtol=1e-2, atol=1e-2)
    assert out.shape == (N, OUT_CH)

    print("KERNEL_OK")
</pallas_src>

<mosaic_0001>
module attributes {stable_mosaic.version = 11 : i64} {
  func.func @_res_block_kernel(%arg0: i32, %arg1: i32, %arg2: memref<128x128xf32, #tpu.memory_space<vmem>>, %arg3: memref<32x128xi8, #tpu.memory_space<vmem>>, %arg4: memref<128x128xf32, #tpu.memory_space<vmem>>, %arg5: memref<1x128xf32, #tpu.memory_space<vmem>>, %arg6: memref<1x128x128xf32, #tpu.memory_space<vmem>>, %arg7: memref<1x128x128xf32, #tpu.memory_space<vmem>>, %arg8: memref<1x1x128xf32, #tpu.memory_space<vmem>>, %arg9: memref<32x128xf32, #tpu.memory_space<vmem>>, %arg10: memref<128x128xf32, #tpu.memory_space<vmem>>, %arg11: memref<128x128xf32, #tpu.memory_space<vmem>>, %arg12: memref<128x128xf32, #tpu.memory_space<vmem>>, %arg13: memref<128x128xf32, #tpu.memory_space<vmem>>, %arg14: memref<128x128xf32, #tpu.memory_space<vmem>>) attributes {dimension_semantics = [#tpu.dimension_semantics<arbitrary>, #tpu.dimension_semantics<arbitrary>], iteration_bounds = array<i64: 2, 4>, scalar_prefetch = 0 : i64, scratch_operands = 5 : i64, tpu.core_type = #tpu.core_type<tc>, window_params = [{pipeline_mode = #tpu.pipeline_mode<synchronous>, transform_indices = @transform_0, window_bounds = array<i64: 128, 128>}, {transform_indices = @transform_1, window_bounds = array<i64: 32, 128>}, {pipeline_mode = #tpu.pipeline_mode<synchronous>, transform_indices = @transform_2, window_bounds = array<i64: 128, 128>}, {pipeline_mode = #tpu.pipeline_mode<synchronous>, transform_indices = @transform_3, window_bounds = array<i64: 1, 128>}, {transform_indices = @transform_4, window_bounds = array<i64: 1, 128, 128>}, {transform_indices = @transform_5, window_bounds = array<i64: 1, 128, 128>}, {transform_indices = @transform_6, window_bounds = array<i64: 1, 1, 128>}, {transform_indices = @transform_7, window_bounds = array<i64: 32, 128>}]} {
    %c32_i32 = arith.constant 32 : i32
    %0 = arith.muli %arg1, %c32_i32 : i32
    %1 = tpu.assume_multiple %0, 32 : i32
    %c0_i32 = arith.constant 0 : i32
    %2 = arith.cmpi eq, %arg0, %c0_i32 : i32
    %c0_i32_0 = arith.constant 0 : i32
    %3 = arith.cmpi eq, %arg1, %c0_i32_0 : i32
    %4 = arith.andi %2, %3 : i1
    %5 = arith.extui %4 : i1 to i32
    %c0_i32_1 = arith.constant 0 : i32
    %6 = arith.cmpi ne, %5, %c0_i32_1 : i32
    scf.if %6 {
      %c0_39 = arith.constant 0 : index
      %c0_40 = arith.constant 0 : index
      %109 = vector.load %arg2[%c0_39, %c0_40] : memref<128x128xf32, #tpu.memory_space<vmem>>, vector<128x128xf32>
      %c0_41 = arith.constant 0 : index
      %c0_42 = arith.constant 0 : index
      %110 = vector.load %arg4[%c0_41, %c0_42] : memref<128x128xf32, #tpu.memory_space<vmem>>, vector<128x128xf32>
      %cst_43 = arith.constant dense<0.000000e+00> : vector<128x128xf32>
      %111 = tpu.matmul %109, %110, %cst_43 {dimension_numbers = #tpu.dot_dimension_numbers<[1], [0], [0], [1], [0, 0, 1, 1], [], []>} : vector<128x128xf32>, vector<128x128xf32>, vector<128x128xf32> -> vector<128x128xf32>
      %c0_44 = arith.constant 0 : index
      %c0_45 = arith.constant 0 : index
      %112 = vector.load %arg5[%c0_44, %c0_45] : memref<1x128xf32, #tpu.memory_space<vmem>>, vector<1x128xf32>
      %113 = vector.broadcast %112 : vector<1x128xf32> to vector<128x128xf32>
      %114 = arith.addf %111, %113 : vector<128x128xf32>
      %c0_46 = arith.constant 0 : index
      %c0_47 = arith.constant 0 : index
      %115 = vector.load %arg10[%c0_46, %c0_47] : memref<128x128xf32, #tpu.memory_space<vmem>>, vector<128x128xf32>
      tpu.vector_store %arg10[%c0_46, %c0_47], %114 {strides = array<i32>} : memref<128x128xf32, #tpu.memory_space<vmem>>, vector<128x128xf32>,
      %c0_48 = arith.constant 0 : index
      %c0_49 = arith.constant 0 : index
      %c0_50 = arith.constant 0 : index
      %116 = vector.load %arg6[%c0_48, %c0_49, %c0_50] : memref<1x128x128xf32, #tpu.memory_space<vmem>>, vector<1x128x128xf32>
      %117 = vector.shape_cast %116 : vector<1x128x128xf32> to vector<128x128xf32>
      %cst_51 = arith.constant dense<0.000000e+00> : vector<128x128xf32>
      %118 = tpu.matmul %114, %117, %cst_51 {dimension_numbers = #tpu.dot_dimension_numbers<[1], [0], [0], [1], [0, 0, 1, 1], [], []>} : vector<128x128xf32>, vector<128x128xf32>, vector<128x128xf32> -> vector<128x128xf32>
      %c0_52 = arith.constant 0 : index
      %c0_53 = arith.constant 0 : index
      %119 = vector.load %arg12[%c0_52, %c0_53] : memref<128x128xf32, #tpu.memory_space<vmem>>, vector<128x128xf32>
      tpu.vector_store %arg12[%c0_52, %c0_53], %118 {strides = array<i32>} : memref<128x128xf32, #tpu.memory_space<vmem>>, vector<128x128xf32>,
      %c0_54 = arith.constant 0 : index
      %c0_55 = arith.constant 0 : index
      %c0_56 = arith.constant 0 : index
      %120 = vector.load %arg7[%c0_54, %c0_55, %c0_56] : memref<1x128x128xf32, #tpu.memory_space<vmem>>, vector<1x128x128xf32>
      %121 = vector.shape_cast %120 : vector<1x128x128xf32> to vector<128x128xf32>
      %cst_57 = arith.constant dense<0.000000e+00> : vector<128x128xf32>
      %122 = tpu.matmul %118, %121, %cst_57 {dimension_numbers = #tpu.dot_dimension_numbers<[1], [0], [0], [1], [0, 0, 1, 1], [], []>} : vector<128x128xf32>, vector<128x128xf32>, vector<128x128xf32> -> vector<128x128xf32>
      %c0_58 = arith.constant 0 : index
      %c0_59 = arith.constant 0 : index
      %123 = vector.load %arg13[%c0_58, %c0_59] : memref<128x128xf32, #tpu.memory_space<vmem>>, vector<128x128xf32>
      tpu.vector_store %arg13[%c0_58, %c0_59], %122 {strides = array<i32>} : memref<128x128xf32, #tpu.memory_space<vmem>>, vector<128x128xf32>,
      %124 = tpu.transpose %122, [1, 0] : vector<128x128xf32> -> vector<128x128xf32>
      %c0_60 = arith.constant 0 : index
      %c0_61 = arith.constant 0 : index
      %125 = vector.load %arg14[%c0_60, %c0_61] : memref<128x128xf32, #tpu.memory_space<vmem>>, vector<128x128xf32>
      tpu.vector_store %arg14[%c0_60, %c0_61], %124 {strides = array<i32>} : memref<128x128xf32, #tpu.memory_space<vmem>>, vector<128x128xf32>,
    } else {
    }
    %c1_i32 = arith.constant 1 : i32
    %7 = arith.cmpi eq, %arg0, %c1_i32 : i32
    %c0_i32_2 = arith.constant 0 : i32
    %8 = arith.cmpi eq, %arg1, %c0_i32_2 : i32
    %9 = arith.andi %7, %8 : i1
    %10 = arith.extui %9 : i1 to i32
    %c0_i32_3 = arith.constant 0 : i32
    %11 = arith.cmpi ne, %10, %c0_i32_3 : i32
    scf.if %11 {
      %c0_39 = arith.constant 0 : index
      %c0_40 = arith.constant 0 : index
      %109 = vector.load %arg11[%c0_39, %c0_40] : memref<128x128xf32, #tpu.memory_space<vmem>>, vector<128x128xf32>
      %c0_41 = arith.constant 0 : index
      %c0_42 = arith.constant 0 : index
      %c0_43 = arith.constant 0 : index
      %110 = vector.load %arg6[%c0_41, %c0_42, %c0_43] : memref<1x128x128xf32, #tpu.memory_space<vmem>>, vector<1x128x128xf32>
      %111 = vector.shape_cast %110 : vector<1x128x128xf32> to vector<128x128xf32>
      %cst_44 = arith.constant dense<0.000000e+00> : vector<128x128xf32>
      %112 = tpu.matmul %109, %111, %cst_44 {dimension_numbers = #tpu.dot_dimension_numbers<[1], [0], [0], [1], [0, 0, 1, 1], [], []>} : vector<128x128xf32>, vector<128x128xf32>, vector<128x128xf32> -> vector<128x128xf32>
      %c0_45 = arith.constant 0 : index
      %c0_46 = arith.constant 0 : index
      %113 = vector.load %arg12[%c0_45, %c0_46] : memref<128x128xf32, #tpu.memory_space<vmem>>, vector<128x128xf32>
      tpu.vector_store %arg12[%c0_45, %c0_46], %112 {strides = array<i32>} : memref<128x128xf32, #tpu.memory_space<vmem>>, vector<128x128xf32>,
      %c0_47 = arith.constant 0 : index
      %c0_48 = arith.constant 0 : index
      %c0_49 = arith.constant 0 : index
      %114 = vector.load %arg7[%c0_47, %c0_48, %c0_49] : memref<1x128x128xf32, #tpu.memory_space<vmem>>, vector<1x128x128xf32>
      %115 = vector.shape_cast %114 : vector<1x128x128xf32> to vector<128x128xf32>
      %cst_50 = arith.constant dense<0.000000e+00> : vector<128x128xf32>
      %116 = tpu.matmul %112, %115, %cst_50 {dimension_numbers = #tpu.dot_dimension_numbers<[1], [0], [0], [1], [0, 0, 1, 1], [], []>} : vector<128x128xf32>, vector<128x128xf32>, vector<128x128xf32> -> vector<128x128xf32>
      %c0_51 = arith.constant 0 : index
      %c0_52 = arith.constant 0 : index
      %117 = vector.load %arg13[%c0_51, %c0_52] : memref<128x128xf32, #tpu.memory_space<vmem>>, vector<128x128xf32>
      tpu.vector_store %arg13[%c0_51, %c0_52], %116 {strides = array<i32>} : memref<128x128xf32, #tpu.memory_space<vmem>>, vector<128x128xf32>,
      %118 = tpu.transpose %116, [1, 0] : vector<128x128xf32> -> vector<128x128xf32>
      %c0_53 = arith.constant 0 : index
      %c0_54 = arith.constant 0 : index
      %119 = vector.load %arg14[%c0_53, %c0_54] : memref<128x128xf32, #tpu.memory_space<vmem>>, vector<128x128xf32>
      tpu.vector_store %arg14[%c0_53, %c0_54], %118 {strides = array<i32>} : memref<128x128xf32, #tpu.memory_space<vmem>>, vector<128x128xf32>,
    } else {
    }
    %c0 = arith.constant 0 : index
    %c0_4 = arith.constant 0 : index
    %12 = vector.load %arg3[%c0, %c0_4] : memref<32x128xi8, #tpu.memory_space<vmem>>, vector<32x128xi8>
    %13 = arith.sitofp %12 : vector<32x128xi8> to vector<32x128xf32>
    %cst = arith.constant 0.000000e+00 : f32
    %14 = vector.broadcast %cst : f32 to vector<32x128xf32>
    %15 = arith.cmpf ogt, %13, %14 : vector<32x128xf32>
    %c0_5 = arith.constant 0 : index
    %c0_6 = arith.constant 0 : index
    %16 = vector.load %arg12[%c0_5, %c0_6] : memref<128x128xf32, #tpu.memory_space<vmem>>, vector<128x128xf32>
    %17 = arith.index_cast %1 : i32 to index
    %c0_7 = arith.constant 0 : index
    %18 = vector.load %arg13[%17, %c0_7] : memref<128x128xf32, #tpu.memory_space<vmem>>, vector<32x128xf32>
    %19 = tpu.iota {dimensions = array<i32: 1>} : vector<1x128xi32>
    %cst_8 = arith.constant 0.000000e+00 : f32
    %20 = vector.broadcast %cst_8 : f32 to vector<32x128xf32>
    %21 = vector.extract_strided_slice %18 {offsets = [0, 2], sizes = [32, 1], strides = [1, 1]} : vector<32x128xf32> to vector<32x1xf32>
    %c0_9 = arith.constant 0 : index
    %c0_10 = arith.constant 0 : index
    %22 = vector.load %arg14[%c0_9, %c0_10] : memref<128x128xf32, #tpu.memory_space<vmem>>, vector<1x128xf32>
    %23 = vector.broadcast %21 : vector<32x1xf32> to vector<32x128xf32>
    %24 = vector.broadcast %22 : vector<1x128xf32> to vector<32x128xf32>
    %25 = arith.addf %23, %24 : vector<32x128xf32>
    %cst_11 = arith.constant 0.000000e+00 : f32
    %26 = vector.broadcast %cst_11 : f32 to vector<32x128xf32>
    %27 = arith.cmpf oge, %25, %26 : vector<32x128xf32>
    %cst_12 = arith.constant 2.000000e-01 : f32
    %28 = vector.broadcast %cst_12 : f32 to vector<32x128xf32>
    %29 = arith.mulf %28, %25 : vector<32x128xf32>
    %30 = arith.select %27, %25, %29 : vector<32x128xi1>, vector<32x128xf32>
    %cst_13 = arith.constant -1.000000e+30 : f32
    %31 = vector.broadcast %cst_13 : f32 to vector<32x128xf32>
    %32 = arith.select %15, %30, %31 : vector<32x128xi1>, vector<32x128xf32>
    %cst_14 = arith.constant dense<0xFF800000> : vector<32xf32>
    %33 = vector.multi_reduction <maximumf>, %32, %cst_14 [1] : vector<32x128xf32> to vector<32xf32>
    %34 = vector.shape_cast %33 : vector<32xf32> to vector<32x1xf32>
    %35 = vector.broadcast %34 : vector<32x1xf32> to vector<32x128xf32>
    %36 = arith.subf %32, %35 : vector<32x128xf32>
    %37 = math.exp %36 : vector<32x128xf32>
    %cst_15 = arith.constant 0.000000e+00 : f32
    %38 = vector.broadcast %cst_15 : f32 to vector<32x128xf32>
    %39 = arith.select %15, %37, %38 : vector<32x128xi1>, vector<32x128xf32>
    %cst_16 = arith.constant dense<0.000000e+00> : vector<32xf32>
    %40 = vector.multi_reduction <add>, %39, %cst_16 [1] : vector<32x128xf32> to vector<32xf32>
    %41 = vector.shape_cast %40 : vector<32xf32> to vector<32x1xf32>
    %cst_17 = arith.constant 0.000000e+00 : f32
    %42 = vector.broadcast %cst_17 : f32 to vector<32x1xf32>
    %43 = arith.cmpf ogt, %41, %42 : vector<32x1xf32>
    %44 = tpu.reciprocal %41 {approx = true} : vector<32x1xf32> -> vector<32x1xf32>
    %cst_18 = arith.constant 0.000000e+00 : f32
    %45 = vector.broadcast %cst_18 : f32 to vector<32x1xf32>
    %46 = arith.select %43, %44, %45 : vector<32x1xi1>, vector<32x1xf32>
    %47 = vector.broadcast %46 : vector<32x1xf32> to vector<32x128xf32>
    %48 = arith.mulf %39, %47 : vector<32x128xf32>
    %c0_i32_19 = arith.constant 0 : i32
    %49 = vector.broadcast %c0_i32_19 : i32 to vector<1x128xi32>
    %50 = arith.cmpi sge, %19, %49 : vector<1x128xi32>
    %c4_i32 = arith.constant 4 : i32
    %51 = vector.broadcast %c4_i32 : i32 to vector<1x128xi32>
    %52 = arith.cmpi slt, %19, %51 : vector<1x128xi32>
    %53 = arith.andi %50, %52 : vector<1x128xi1>
    %54 = arith.extui %53 : vector<1x128xi1> to vector<1x128xi32>
    %55 = arith.sitofp %54 : vector<1x128xi32> to vector<1x128xf32>
    %cst_20 = arith.constant dense<0.000000e+00> : vector<32x128xf32>
    %56 = tpu.matmul %48, %16, %cst_20 {dimension_numbers = #tpu.dot_dimension_numbers<[1], [0], [0], [1], [0, 0, 1, 1], [], []>} : vector<32x128xf32>, vector<128x128xf32>, vector<32x128xf32> -> vector<32x128xf32>
    %57 = vector.broadcast %55 : vector<1x128xf32> to vector<32x128xf32>
    %58 = arith.mulf %56, %57 : vector<32x128xf32>
    %59 = arith.addf %20, %58 : vector<32x128xf32>
    %60 = vector.extract_strided_slice %18 {offsets = [0, 3], sizes = [32, 1], strides = [1, 1]} : vector<32x128xf32> to vector<32x1xf32>
    %c1 = arith.constant 1 : index
    %c0_21 = arith.constant 0 : index
    %61 = vector.load %arg14[%c1, %c0_21] : memref<128x128xf32, #tpu.memory_space<vmem>>, vector<1x128xf32>
    %62 = vector.broadcast %60 : vector<32x1xf32> to vector<32x128xf32>
    %63 = vector.broadcast %61 : vector<1x128xf32> to vector<32x128xf32>
    %64 = arith.addf %62, %63 : vector<32x128xf32>
    %cst_22 = arith.constant 0.000000e+00 : f32
    %65 = vector.broadcast %cst_22 : f32 to vector<32x128xf32>
    %66 = arith.cmpf oge, %64, %65 : vector<32x128xf32>
    %cst_23 = arith.constant 2.000000e-01 : f32
    %67 = vector.broadcast %cst_23 : f32 to vector<32x128xf32>
    %68 = arith.mulf %67, %64 : vector<32x128xf32>
    %69 = arith.select %66, %64, %68 : vector<32x128xi1>, vector<32x128xf32>
    %cst_24 = arith.constant -1.000000e+30 : f32
    %70 = vector.broadcast %cst_24 : f32 to vector<32x128xf32>
    %71 = arith.select %15, %69, %70 : vector<32x128xi1>, vector<32x128xf32>
    %cst_25 = arith.constant dense<0xFF800000> : vector<32xf32>
    %72 = vector.multi_reduction <maximumf>, %71, %cst_25 [1] : vector<32x128xf32> to vector<32xf32>
    %73 = vector.shape_cast %72 : vector<32xf32> to vector<32x1xf32>
    %74 = vector.broadcast %73 : vector<32x1xf32> to vector<32x128xf32>
    %75 = arith.subf %71, %74 : vector<32x128xf32>
    %76 = math.exp %75 : vector<32x128xf32>
    %cst_26 = arith.constant 0.000000e+00 : f32
    %77 = vector.broadcast %cst_26 : f32 to vector<32x128xf32>
    %78 = arith.select %15, %76, %77 : vector<32x128xi1>, vector<32x128xf32>
    %cst_27 = arith.constant dense<0.000000e+00> : vector<32xf32>
    %79 = vector.multi_reduction <add>, %78, %cst_27 [1] : vector<32x128xf32> to vector<32xf32>
    %80 = vector.shape_cast %79 : vector<32xf32> to vector<32x1xf32>
    %cst_28 = arith.constant 0.000000e+00 : f32
    %81 = vector.broadcast %cst_28 : f32 to vector<32x1xf32>
    %82 = arith.cmpf ogt, %80, %81 : vector<32x1xf32>
    %83 = tpu.reciprocal %80 {approx = true} : vector<32x1xf32> -> vector<32x1xf32>
    %cst_29 = arith.constant 0.000000e+00 : f32
    %84 = vector.broadcast %cst_29 : f32 to vector<32x1xf32>
    %85 = arith.select %82, %83, %84 : vector<32x1xi1>, vector<32x1xf32>
    %86 = vector.broadcast %85 : vector<32x1xf32> to vector<32x128xf32>
    %87 = arith.mulf %78, %86 : vector<32x128xf32>
    %c4_i32_30 = arith.constant 4 : i32
    %88 = vector.broadcast %c4_i32_30 : i32 to vector<1x128xi32>
    %89 = arith.cmpi sge, %19, %88 : vector<1x128xi32>
    %c8_i32 = arith.constant 8 : i32
    %90 = vector.broadcast %c8_i32 : i32 to vector<1x128xi32>
    %91 = arith.cmpi slt, %19, %90 : vector<1x128xi32>
    %92 = arith.andi %89, %91 : vector<1x128xi1>
    %93 = arith.extui %92 : vector<1x128xi1> to vector<1x128xi32>
    %94 = arith.sitofp %93 : vector<1x128xi32> to vector<1x128xf32>
    %cst_31 = arith.constant dense<0.000000e+00> : vector<32x128xf32>
    %95 = tpu.matmul %87, %16, %cst_31 {dimension_numbers = #tpu.dot_dimension_numbers<[1], [0], [0], [1], [0, 0, 1, 1], [], []>} : vector<32x128xf32>, vector<128x128xf32>, vector<32x128xf32> -> vector<32x128xf32>
    %96 = vector.broadcast %94 : vector<1x128xf32> to vector<32x128xf32>
    %97 = arith.mulf %95, %96 : vector<32x128xf32>
    %98 = arith.addf %59, %97 : vector<32x128xf32>
    %c0_32 = arith.constant 0 : index
    %c0_33 = arith.constant 0 : index
    %c0_34 = arith.constant 0 : index
    %99 = vector.load %arg8[%c0_32, %c0_33, %c0_34] : memref<1x1x128xf32, #tpu.memory_space<vmem>>, vector<1x1x128xf32>
    %100 = vector.shape_cast %99 : vector<1x1x128xf32> to vector<1x128xf32>
    %101 = vector.broadcast %100 : vector<1x128xf32> to vector<32x128xf32>
    %102 = arith.addf %98, %101 : vector<32x128xf32>
    %c0_i32_35 = arith.constant 0 : i32
    %103 = arith.cmpi eq, %arg0, %c0_i32_35 : i32
    %104 = arith.extui %103 : i1 to i32
    %c0_i32_36 = arith.constant 0 : i32
    %105 = arith.cmpi ne, %104, %c0_i32_36 : i32
    scf.if %105 {
      %cst_39 = arith.constant 0.000000e+00 : f32
      %109 = vector.broadcast %cst_39 : f32 to vector<32x128xf32>
      %110 = arith.cmpf oge, %102, %109 : vector<32x128xf32>
      %cst_40 = arith.constant 0.00999999977 : f32
      %111 = vector.broadcast %cst_40 : f32 to vector<32x128xf32>
      %112 = arith.mulf %111, %102 : vector<32x128xf32>
      %113 = arith.select %110, %102, %112 : vector<32x128xi1>, vector<32x128xf32>
      %114 = arith.index_cast %1 : i32 to index
      %c0_41 = arith.constant 0 : index
      %115 = vector.load %arg11[%114, %c0_41] : memref<128x128xf32, #tpu.memory_space<vmem>>, vector<32x128xf32>
      tpu.vector_store %arg11[%114, %c0_41], %113 {strides = array<i32>} : memref<128x128xf32, #tpu.memory_space<vmem>>, vector<32x128xf32>,
    } else {
    }
    %c1_i32_37 = arith.constant 1 : i32
    %106 = arith.cmpi eq, %arg0, %c1_i32_37 : i32
    %107 = arith.extui %106 : i1 to i32
    %c0_i32_38 = arith.constant 0 : i32
    %108 = arith.cmpi ne, %107, %c0_i32_38 : i32
    scf.if %108 {
      %109 = arith.index_cast %1 : i32 to index
      %c0_39 = arith.constant 0 : index
      %110 = vector.load %arg10[%109, %c0_39] : memref<128x128xf32, #tpu.memory_space<vmem>>, vector<32x128xf32>
      %111 = arith.addf %102, %110 : vector<32x128xf32>
      %c0_40 = arith.constant 0 : index
      %c0_41 = arith.constant 0 : index
      %112 = vector.load %arg9[%c0_40, %c0_41] : memref<32x128xf32, #tpu.memory_space<vmem>>, vector<32x128xf32>
      tpu.vector_store %arg9[%c0_40, %c0_41], %111 {strides = array<i32>} : memref<32x128xf32, #tpu.memory_space<vmem>>, vector<32x128xf32>,
    } else {
    }
    return
  }
  func.func @transform_0(%arg0: i32, %arg1: i32) -> (i32, i32) {
    %c0_i32 = arith.constant 0 : i32
    %c0_i32_0 = arith.constant 0 : i32
    %c0_i32_1 = arith.constant 0 : i32
    return %c0_i32, %c0_i32_0 : i32, i32
  }
  func.func @transform_1(%arg0: i32, %arg1: i32) -> (i32, i32) {
    %c0_i32 = arith.constant 0 : i32
    %c0_i32_0 = arith.constant 0 : i32
    return %arg1, %c0_i32 : i32, i32
  }
  func.func @transform_2(%arg0: i32, %arg1: i32) -> (i32, i32) {
    %c0_i32 = arith.constant 0 : i32
    %c0_i32_0 = arith.constant 0 : i32
    %c0_i32_1 = arith.constant 0 : i32
    return %c0_i32, %c0_i32_0 : i32, i32
  }
  func.func @transform_3(%arg0: i32, %arg1: i32) -> (i32, i32) {
    %c0_i32 = arith.constant 0 : i32
    %c0_i32_0 = arith.constant 0 : i32
    %c0_i32_1 = arith.constant 0 : i32
    return %c0_i32, %c0_i32_0 : i32, i32
  }
  func.func @transform_4(%arg0: i32, %arg1: i32) -> (i32, i32, i32) {
    %c0_i32 = arith.constant 0 : i32
    %c0_i32_0 = arith.constant 0 : i32
    %c0_i32_1 = arith.constant 0 : i32
    return %arg0, %c0_i32, %c0_i32_0 : i32, i32, i32
  }
  func.func @transform_5(%arg0: i32, %arg1: i32) -> (i32, i32, i32) {
    %c0_i32 = arith.constant 0 : i32
    %c0_i32_0 = arith.constant 0 : i32
    %c0_i32_1 = arith.constant 0 : i32
    return %arg0, %c0_i32, %c0_i32_0 : i32, i32, i32
  }
  func.func @transform_6(%arg0: i32, %arg1: i32) -> (i32, i32, i32) {
    %c0_i32 = arith.constant 0 : i32
    %c0_i32_0 = arith.constant 0 : i32
    %c0_i32_1 = arith.constant 0 : i32
    return %arg0, %c0_i32, %c0_i32_0 : i32, i32, i32
  }
  func.func @transform_7(%arg0: i32, %arg1: i32) -> (i32, i32) {
    %0 = arith.muli %arg0, %arg1 : i32
    %c0_i32 = arith.constant 0 : i32
    %c0_i32_0 = arith.constant 0 : i32
    return %0, %c0_i32 : i32, i32
  }
}

</mosaic_0001>

<bundles_post_ra>
// kernel: tpu_custom_call.1
= control target key start
LH: loop header
LB: loop body
LE: loop exit
PB: predicated region body
PF: predicated region fallthrough
CT: control target
= control target key end

     0   :  { %s2842_s0 = inlined_call_operand.hbm [shape: f32[128,128], index: 0, kind: input, shape index: {}]   ;;  %s2843_s1 = inlined_call_operand.hbm [shape: s8[128,128], index: 1, kind: input, shape index: {}]   ;;  %s2844_s2 = inlined_call_operand.hbm [shape: f32[128,128], index: 2, kind: input, shape index: {}]   ;;  %s2845_s3 = inlined_call_operand.vmem [shape: f32[1,128], index: 3, kind: input, shape index: {}]   ;;  %s2846_s4 = inlined_call_operand.hbm [shape: f32[2,128,128], index: 4, kind: input, shape index: {}]   ;;  %s2847_s5 = inlined_call_operand.hbm [shape: f32[2,128,128], index: 5, kind: input, shape index: {}]   ;;  %s2848_s6 = inlined_call_operand.vmem [shape: f32[2,1,128], index: 6, kind: input, shape index: {}]   ;;  %s2849_s7 = inlined_call_operand.hbm [shape: f32[128,128], index: 7, kind: output, shape index: {}]  }
   0x1   :  { %2872 = sst [smem:[#allocation36_spill]] %s2842_s0 }
   0x2   :  { %2873 = sst [smem:[#allocation37_spill]] %s2844_s2 }
   0x3   :  { %2874 = sst [smem:[#allocation38_spill]] %s2845_s3 }
   0x4   :  { %2875 = sst [smem:[#allocation39_spill]] %s2846_s4 }
   0x5   :  { %2876 = sst [smem:[#allocation40_spill]] %s2847_s5 }
   0x6   :  { %2877 = sst [smem:[#allocation41_spill]] %s2848_s6 }
   0x7   :  { %2878 = sst [smem:[#allocation42_spill]] %s2849_s7 }
   0x8   :  { %12 = vsyncpa [#allocation8], 0 }
   0x9   :  { %13 = vsyncpa [#allocation11], 0 }
   0xa   :  { %15 = vsyncpa [#allocation11 + $0x1], 0 }
   0xb   :  { %16 = vsyncpa [#allocation14], 0 }
   0xc   :  { %18 = vsyncpa [#allocation14 + $0x1], 0 }
   0xd   :  { %19 = vsyncpa [#allocation9], 0 }
   0xe   :  { %21 = vsyncpa [#allocation9 + $0x1], 0  ;;  %s2301_s24 = smov 0   ;;  %s2303_s25 = smov 0  }
   0xf   :  { %s2305_s26 = smov 0   ;;  %s2307_s27 = smov 0  }
  0x10   :  { %s2309_s28 = smov 0   ;;  %s2311_s29 = smov 0  }
  0x11   :  { %s2313_s30 = smov 0   ;;  %s2315_s8 = smov 0  }
  0x12   :  { %s2317_s9 = smov 0   ;;  %s2319_s10 = smov 0  }
  0x13   :  { %s2321_s11 = smov 0   ;;  %s2323_s12 = smov 0  }
  0x14   :  { %s2325_s13 = smov 0   ;;  %s2327_s14 = smov 0  }
  0x15 LB: > { %2879 = sst [smem:[#allocation22_spill]] %s2198_s24  ;;  %s2372_s15 = sadd.s32 4294967295, %s2250_s14   ;;  %s2250_s14 = sphi %s2327_s14, %s27_s14   ;;  %s2246_s13 = sphi %s2325_s13, %s2938_s13   ;;  %s2242_s12 = sphi %s2323_s12, %s2946_s12   ;;  %s2238_s11 = sphi %s2321_s11, %s2936_s11   ;;  %s2234_s10 = sphi %s2319_s10, %s2945_s10   ;;  %s2230_s9 = sphi %s2317_s9, %s2944_s9   ;;  %s2226_s8 = sphi %s2315_s8, %s2943_s8   ;;  %s2222_s30 = sphi %s2313_s30, %s2934_s30   ;;  %s2218_s29 = sphi %s2311_s29, %s2942_s29   ;;  %s2214_s28 = sphi %s2309_s28, %s2941_s28   ;;  %s2210_s27 = sphi %s2307_s27, %s2933_s27   ;;  %s2206_s26 = sphi %s2305_s26, %s2940_s26   ;;  %s2202_s25 = sphi %s2303_s25, %s2939_s25   ;;  %s2198_s24 = sphi %s2301_s24, %s2932_s24  }
  0x16   : > { %2880 = sst [smem:[#allocation23_spill]] %s2202_s25  ;;  %s1590_s16 = sadd.s32 4294967294, %s2250_s14  }
  0x17   : > { %2881 = sst [smem:[#allocation24_spill]] %s2214_s28  ;;  %p81_p0 = scmp.eq.s32.totalorder %s2372_s15, 0 }
  0x18   : > { %2882 = sst [smem:[#allocation25_spill]] %s2226_s8  ;;  %p225_p1 = scmp.ne.s32.totalorder %s2206_s26, %s2202_s25 }
  0x19   : > { %2883 = sst [smem:[#allocation26_spill]] %s2234_s10  ;;  %p226_p2 = scmp.eq.s32.totalorder %s2372_s15, 7 }
  0x1a   : > { %2884 = sst [smem:[#allocation27_spill]] %s2238_s11  ;;  %p231_p3 = scmp.ne.s32.totalorder %s2202_s25, %s2198_s24 }
  0x1b   : > { %2885 = sst [smem:[#allocation28_spill]] %s2246_s13  ;;  %p232_p4 = scmp.eq.s32.totalorder %s1590_s16, 7 }
  0x1c   : > { %p1591_p5 = scmp.ge.s32.totalorder %s2250_s14, 1  ;;  %p2382_p6 = por %p226_p2, %p225_p1 }
  0x1d   : > { %p239_p7 = scmp.lt.s32.totalorder %s2250_s14, 9  ;;  %p2387_p8 = por %p232_p4, %p231_p3 }
  0x1e   : > { %s2886_s17 = scalar_select %p2382_p6, 1, 0 }
  0x1f   : > { %s2888_s18 = scalar_select %p2387_p8, 1, 0 }
  0x20   : > { %2887 = sst [smem:[#allocation29_spill]] %s2886_s17  ;;  %p2391_p9 = pnand %p1591_p5, %p239_p7 }
  0x21   : > { %2889 = sst [smem:[#allocation30_spill]] %s2888_s18  ;;  %s2252_s16 = smov [#allocation12]  }
  0x22   : > { %s2891_s2 = sld [smem:[#allocation37_spill]]  ;;  %p1751_p10 = pneg %p2391_p9 }
  0x23   : > { %s266_s18 = sshll.u32 %s2252_s16, 4  ;;  %s2855_s20 = smov 128   ;;  %s267_s18 = int_to_ptr.vmem [resolvable:$true] %s266_s18 }
  0x24   : > { %p2402_p11 = pnand %p1751_p10, %p81_p0  ;;  %s2857_s21 = smov 8  }
  0x25   : > { %p75_p12 = scmp.eq.s32.totalorder %s2250_s14, 0  ;;  %p142_p13 = scmp.ne.s32.totalorder %s2218_s29, %s2214_s28 }
  0x26   : > { %p148_p1 = scmp.ne.s32.totalorder %s2214_s28, %s2210_s27  ;;  %p1774_p2 = scmp.lt.s32.totalorder %s2250_s14, 8 }
  0x27   : > { %p144_p3 = por %p142_p13, %p75_p12  ;;  %s304_s7 = sand.u32 1, %s2218_s29  }
  0x28   : > { %s264_s22 = sshll.u32 %s2891_s2, 4  ;;  %p2423_p4 = por %p148_p1, %p81_p0  ;;  %s265_s22 = int_to_ptr.hbm [resolvable:$true] %s264_s22 }
  0x29   : > { %1757 = dma.hbm_to_vmem [thread:$0]  (!%p2402_p11), %s265_s22, 2048, %s267_s18, [#allocation11], %s2855_s20, %s2855_s20, %s2857_s21  }
  0x2a   : > { %s2893_s16 = scalar_select %p2423_p4, 1, 0 }
  0x2b   : > { %s1597_s17 = sshll.u32 %s304_s7, 7  ;;  %s1620_s3 = sshll.u32 %s2246_s13, 7 }
  0x2c   : > { %2894 = sst [smem:[#allocation31_spill]] %s2893_s16  ;;  %s306_s20 = scalar_lea.vmem [#allocation13], %s1597_s17 }
  0x2d   : > { %s2895_s4 = sld [smem:[#allocation39_spill]]  ;;  %s314_s27 = sshll.u32 %s306_s20, 4  ;;  %s315_s27 = int_to_ptr.vmem [resolvable:$true] %s314_s27 }
  0x2e   : > { %p2434_p5 = pnand %p1774_p2, %p144_p3  ;;  %s2897_s5 = sld [smem:[#allocation40_spill]] }
  0x2f   : > { %s328_s6 = scalar_lea.vmem [#allocation15], %s1597_s17  ;;  %s2899_s11 = smov 8  }
  0x30   : > { %s2441_s18 = sshll.u32 %s328_s6, 4  ;;  %s2900_s25 = smov 128   ;;  %s337_s18 = int_to_ptr.vmem [resolvable:$true] %s2441_s18 }
  0x31   : > { %s2901_s0 = sld [smem:[#allocation36_spill]]  ;;  %s2255_s17 = smov [#allocation7]  }
  0x32   : > { %s67_s6 = sadd.s32 1, %s2230_s9  ;;  %p74_p10 = scmp.ne.s32.totalorder %s2230_s9, %s2226_s8 }
  0x33   : > { %s311_s22 = scalar_lea.hbm %s2895_s4, %s1620_s3  ;;  %p80_p3 = scmp.ne.s32.totalorder %s2226_s8, %s2222_s30 }
  0x34   : > { %s312_s2 = sshll.u32 %s311_s22, 4  ;;  %s333_s7 = scalar_lea.hbm %s2897_s5, %s1620_s3  ;;  %s313_s2 = int_to_ptr.hbm [resolvable:$true] %s312_s2 }
  0x35   : > { %s334_s20 = sshll.u32 %s333_s7, 4  ;;  %s2898_s22 = sand.u32 1, %s2250_s14   ;;  %s2453_s20 = int_to_ptr.hbm [resolvable:$true] %s334_s20 }
  0x36   : > { %s2445_s4 = scalar_lea.sflag [#allocation14], %s2898_s22  ;;  %s252_s7 = sshll.u32 %s2255_s17, 4  ;;  %s253_s7 = int_to_ptr.vmem [resolvable:$true] %s252_s7 }
  0x37   : > { %1764 = dma.hbm_to_vmem [thread:$0]  (!%p2434_p5), %s313_s2, 2048, %s315_s27, %s2445_s4, %s2900_s25, %s2900_s25, %s2899_s11  }
  0x38   : > { %s250_s10 = sshll.u32 %s2901_s0, 4  ;;  %s36_s2 = sadd.s32 1, %s2242_s12  ;;  %s251_s10 = int_to_ptr.hbm [resolvable:$true] %s250_s10 }
  0x39   : > { %1754 = dma.hbm_to_vmem [thread:$0]  (!%p2402_p11), %s251_s10, 2048, %s253_s7, [#allocation8], %s2900_s25, %s2900_s25, %s2899_s11  }
  0x3a   : > { %p37_p7 = scmp.ge.s32.totalorder %s36_s2, 4  ;;  %s39_s27 = sadd.s32 1, %s2246_s13 }
  0x3b   : > { %p2476_p13 = por %p75_p12, %p74_p10  ;;  %s210_s3 = smul.u32 %s2242_s12, %s2246_s13 }
  0x3c   : > { %s2948_s2 = smov (%p37_p7, %s36_s2), 0  ;;  %s2950_s27 = smov (!%p37_p7, %s39_s27), %s2246_s13 }
  0x3d   : > { %2902 = sst [smem:[#allocation32_spill]] %s2948_s2  ;;  %s64_s23 = ssub.s32 %s2242_s12, %s2948_s2 }
  0x3e   : > { %p41_p11 = scmp.ge.s32.totalorder %s2950_s27, 2  ;;  %p65_p1 = scmp.eq.s32.totalorder %s64_s23, 0 }
  0x3f   : > { %p2491_p7 = por %p81_p0, %p80_p3  ;;  %s215_s30 = sadd.s32 1, %s2206_s26 }
  0x40   : > { %s2952_s27 = smov (%p41_p11, %s2950_s27), 0  ;;  %s2908_s23 = sadd.s32 1, %s2218_s29 }
  0x41   : > { %2904 = sst [smem:[#allocation33_spill]] %s2952_s27  ;;  %s132_s17 = ssub.s32 %s2246_s13, %s2952_s27 }
  0x42   : > { %s2487_s24 = scalar_select %p65_p1, %s2230_s9, %s67_s6  }
  0x43   : > { %s2906_s10 = scalar_select %p2491_p7, 1, 0 }
  0x44   : > { %2905 = sst [smem:[#allocation34_spill]] %s2487_s24  ;;  %p133_p12 = scmp.eq.s32.totalorder %s132_s17, 0 }
  0x45   : > { %2907 = sst [smem:[#allocation35_spill]] %s2906_s10  ;;  %s211_s7 = smul.u32 %s2952_s27, %s2948_s2 }
  0x46   : > { %s2503_s0 = scalar_select %p133_p12, %s2218_s29, %s2908_s23  }
  0x47   : > { %s212_s6 = ssub.s32 %s210_s3, %s211_s7  ;;  %s285_s5 = sand.u32 1, %s2230_s9  }
  0x48   : > { %p213_p10 = scmp.eq.s32.totalorder %s212_s6, 0  ;;  %s1595_s24 = sshll.u32 %s285_s5, 3 }
  0x49   : > { %s1596_s16 = sshll.u32 %s2242_s12, 3  ;;  %s287_s2 = scalar_lea.vmem [#allocation10], %s1595_s24 }
  0x4a   : > { %s2508_s28 = scalar_select %p213_p10, %s2206_s26, %s215_s30  }
  0x4b   : > { %s291_s27 = scalar_lea.hbm %s2843_s1, %s1596_s16  ;;  %s295_s10 = sshll.u32 %s287_s2, 4  ;;  %s296_s10 = int_to_ptr.vmem [resolvable:$true] %s295_s10 }
  0x4c   : > { %s293_s8 = sshll.u32 %s291_s27, 4  ;;  %p1759_p11 = pnand %p1774_p2, %p2476_p13  ;;  %s294_s8 = int_to_ptr.hbm [resolvable:$true] %s293_s8 }
  0x4d   : > { %1767 = dma.hbm_to_vmem [thread:$0]  (!%p2434_p5), %s2453_s20, 2048, %s337_s18, %s2445_s4, %s2900_s25, %s2900_s25, %s2899_s11  }
  0x4e   : > { %s2909_s5 = sand.u32 1, %s2250_s14   ;;  %354 = sbr.rel (%p2391_p9) target bundleno = 1998 (0x7ce), region = 48 }
  0x4f   : > { %s284_s3 = scalar_lea.sflag [#allocation11], %s2909_s5 }
  0x50   : > { %1761 = dma.hbm_to_vmem [thread:$0]  (!%p1759_p11), %s294_s8, 128, %s296_s10, %s284_s3  }
  0x53   : > { %2177 = dma.done.wait (%p81_p0), [#allocation8], 2048  }
  0x54   : > { %2179 = vsyncadd (%p81_p0), [#allocation8], 4294965248  ;;  %s2910_s13 = sld [smem:[#allocation25_spill]]  ;;  %s361_s16 = sand.u32 1, %s2372_s15  }
  0x55   : > { %s362_s4 = scalar_lea.sflag [#allocation11], %s361_s16 }
  0x5a   : > { %s363_s2 = sand.u32 1, %s2910_s13  }
  0x5b   : > { %s2536_s27 = sshll.u32 %s363_s2, 3 }
  0x5c   : > { %s365_s25 = scalar_lea.vmem [#allocation10], %s2536_s27 }
  0x5d   : > { %2181 = dma.done.wait (%p2491_p7), %s362_s4, 128  }
  0x5e   : > { %2183 = vsyncadd (%p2491_p7), %s362_s4, 4294967168 }
  0x5f   : > { %2185 = dma.done.wait (%p81_p0), [#allocation11], 2048  }
  0x60   : > { %2187 = vsyncadd (%p81_p0), [#allocation11], 4294965248  ;;  %s2912_s8 = sld [smem:[#allocation24_spill]]  ;;  %s377_s20 = scalar_lea.sflag [#allocation14], %s361_s16 }
  0x66   : > { %s378_s19 = sand.u32 1, %s2912_s8  }
  0x67   : > { %s1607_s18 = sshll.u32 %s378_s19, 7 }
  0x68   : > { %s2548_s22 = scalar_lea.vmem [#allocation13], %s1607_s18 }
  0x69   : > { %2189 = dma.done.wait (%p2423_p4), %s377_s20, 4096  }
  0x6a   : > { %2191 = vsyncadd (%p2423_p4), %s377_s20, 4294963200  ;;  %s2914_s24 = sld [smem:[#allocation23_spill]]  ;;  %s2572_s21 = scalar_lea.vmem [#allocation15], %s1607_s18 }
  0x6b   : > { %s2915_s10 = sld [smem:[#allocation27_spill]] }
  0x6c   : > { %s2916_s7 = sld [smem:[#allocation26_spill]] }
  0x6d   : > { %s2917_s3 = sld [smem:[#allocation41_spill]] }
  0x70   : > { %s432_s15 = sand.u32 1, %s2914_s24  }
  0x71   : > { %s1609_s30 = sshll.u32 %s432_s15, 5  ;;  %p435_p0 = scmp.lt.s32.totalorder %s2915_s10, 1 }
  0x72   : > { %s2559_s23 = sshll.u32 %s2916_s7, 5  ;;  %p441_p9 = scmp.eq.s32.totalorder %s2915_s10, 0 }
  0x73   : > { %s2562_s6 = scalar_select %p435_p0, %s2915_s10, 1 }
  0x74   : > { %p442_p2 = scmp.eq.s32.totalorder %s2916_s7, 0  ;;  %s2574_s16 = scalar_lea.vmem [#allocation16], %s1609_s30 }
  0x75   : > { %s437_s13 = scalar_lea.vmem %s2917_s3, %s2562_s6 }
  0x76   : > { %p443_p4 = pnand %p442_p2, %p441_p9 }
  0x77   : > { %s2918_s8 = sld [smem:[#allocation38_spill]] (!%p443_p4) }
  0x78   : > { %446 = sbr.rel (%p443_p4) target bundleno = 828 (0x33c), region = 72 }
  0x7d   : > { %v478_v0 = vld [vmem:[#allocation12 + $0x78] sm:$0xff]  ;;  %v477_v1 = vld [vmem:[#allocation12 + $0x70] sm:$0xff]  ;;  %v476_v2 = vld [vmem:[#allocation12 + $0x68] sm:$0xff] }
  0x7e   : > { %483 = vmatpush.msra.mxu0 %v478_v0  ;;  %1623 = vmatpush.msra.mxu3 %v478_v0  ;;  %v475_v3 = vld [vmem:[#allocation12 + $0x60] sm:$0xff]  ;;  %v474_v4 = vld [vmem:[#allocation12 + $0x58] sm:$0xff]  ;;  %v473_v5 = vld [vmem:[#allocation12 + $0x50] sm:$0xff] }
  0x7f   : > { %v472_v6 = vld [vmem:[#allocation12 + $0x48] sm:$0xff]  ;;  %v471_v7 = vld [vmem:[#allocation12 + $0x40] sm:$0xff]  ;;  %v470_v8 = vld [vmem:[#allocation12 + $0x38] sm:$0xff] }
  0x80   : > { %484 = vmatpush.msra.mxu0 %v477_v1  ;;  %1624 = vmatpush.msra.mxu3 %v477_v1  ;;  %v469_v9 = vld [vmem:[#allocation12 + $0x30] sm:$0xff]  ;;  %v468_v10 = vld [vmem:[#allocation12 + $0x28] sm:$0xff]  ;;  %v467_v11 = vld [vmem:[#allocation12 + $0x20] sm:$0xff] }
  0x81   : > { %v466_v12 = vld [vmem:[#allocation12 + $0x18] sm:$0xff]  ;;  %v465_v13 = vld [vmem:[#allocation12 + $0x10] sm:$0xff]  ;;  %v464_v14 = vld [vmem:[#allocation12 + $0x8] sm:$0xff] }
  0x82   : > { %485 = vmatpush.msra.mxu0 %v476_v2  ;;  %1625 = vmatpush.msra.mxu3 %v476_v2  ;;  %v463_v15 = vld [vmem:[#allocation12] sm:$0xff]  ;;  %v447_v16 = vld [vmem:[#allocation7] sm:$0xff]  ;;  %v448_v17 = vld [vmem:[#allocation7 + $0x8] sm:$0xff] }
  0x83   : > { %v449_v18 = vld [vmem:[#allocation7 + $0x10] sm:$0xff]  ;;  %v450_v19 = vld [vmem:[#allocation7 + $0x18] sm:$0xff]  ;;  %v451_v20 = vld [vmem:[#allocation7 + $0x20] sm:$0xff] }
  0x84   : > { %486 = vmatpush.msra.mxu0 %v475_v3  ;;  %1626 = vmatpush.msra.mxu3 %v475_v3  ;;  %v452_v21 = vld [vmem:[#allocation7 + $0x28] sm:$0xff]  ;;  %v453_v22 = vld [vmem:[#allocation7 + $0x30] sm:$0xff]  ;;  %v459_v23 = vld [vmem:[#allocation7 + $0x60] sm:$0xff] }
  0x85   : > { %v454_v24 = vld [vmem:[#allocation7 + $0x38] sm:$0xff]  ;;  %v460_v25 = vld [vmem:[#allocation7 + $0x68] sm:$0xff]  ;;  %v578_v27 = vld [vmem:[%s2548_s22 + $0x70] sm:$0xff] }
  0x86   : > { %487 = vmatpush.msra.mxu0 %v474_v4  ;;  %1627 = vmatpush.msra.mxu3 %v474_v4  ;;  %v579_v26 = vld [vmem:[%s2548_s22 + $0x78] sm:$0xff]  ;;  %v577_v28 = vld [vmem:[%s2548_s22 + $0x68] sm:$0xff]  ;;  %v576_v29 = vld [vmem:[%s2548_s22 + $0x60] sm:$0xff] }
  0x87   : > { %580 = vmatpush.msra.mxu1 %v579_v26  ;;  %v455_v30 = vld [vmem:[#allocation7 + $0x40] sm:$0xff]  ;;  %v461_v31 = vld [vmem:[#allocation7 + $0x70] sm:$0xff]  ;;  %v575_v32 = vld [vmem:[%s2548_s22 + $0x58] sm:$0xff] }
  0x88   : > { %488 = vmatpush.msra.mxu0 %v473_v5  ;;  %1628 = vmatpush.msra.mxu3 %v473_v5  ;;  %v574_v33 = vld [vmem:[%s2548_s22 + $0x50] sm:$0xff]  ;;  %v573_v34 = vld [vmem:[%s2548_s22 + $0x48] sm:$0xff]  ;;  %v572_v35 = vld [vmem:[%s2548_s22 + $0x40] sm:$0xff] }
  0x89   : > { %581 = vmatpush.msra.mxu1 %v578_v27  ;;  %v456_v36 = vld [vmem:[#allocation7 + $0x48] sm:$0xff]  ;;  %v462_v37 = vld [vmem:[#allocation7 + $0x78] sm:$0xff]  ;;  %v570_v39 = vld [vmem:[%s2548_s22 + $0x30] sm:$0xff] }
  0x8a   : > { %489 = vmatpush.msra.mxu0 %v472_v6  ;;  %1629 = vmatpush.msra.mxu3 %v472_v6  ;;  %v571_v38 = vld [vmem:[%s2548_s22 + $0x38] sm:$0xff]  ;;  %v569_v40 = vld [vmem:[%s2548_s22 + $0x28] sm:$0xff]  ;;  %v568_v41 = vld [vmem:[%s2548_s22 + $0x20] sm:$0xff] }
  0x8b   : > { %582 = vmatpush.msra.mxu1 %v577_v28  ;;  %v457_v42 = vld [vmem:[#allocation7 + $0x50] sm:$0xff]  ;;  %v567_v43 = vld [vmem:[%s2548_s22 + $0x18] sm:$0xff]  ;;  %v566_v44 = vld [vmem:[%s2548_s22 + $0x10] sm:$0xff] }
  0x8c   : > { %490 = vmatpush.msra.mxu0 %v471_v7  ;;  %1630 = vmatpush.msra.mxu3 %v471_v7  ;;  %v458_v45 = vld [vmem:[#allocation7 + $0x58] sm:$0xff]  ;;  %v564_v47 = vld [vmem:[%s2548_s22] sm:$0xff]  ;;  %v2595_v48 = vld [vmem:[%s2918_s8] ss:$0 sm:$0xff] }
  0x8d   : > { %583 = vmatpush.msra.mxu1 %v576_v29  ;;  %v565_v46 = vld [vmem:[%s2548_s22 + $0x8] sm:$0xff]  ;;  %v676_v3 = vld [vmem:[%s2572_s21 + $0x78] sm:$0xff]  ;;  %v675_v4 = vld [vmem:[%s2572_s21 + $0x70] sm:$0xff] }
  0x8e   : > { %491 = vmatpush.msra.mxu0 %v470_v8  ;;  %1631 = vmatpush.msra.mxu3 %v470_v8  ;;  %v674_v5 = vld [vmem:[%s2572_s21 + $0x68] sm:$0xff]  ;;  %v673_v6 = vld [vmem:[%s2572_s21 + $0x60] sm:$0xff] }
  0x8f   : > { %584 = vmatpush.msra.mxu1 %v575_v32  ;;  %677 = vmatpush.msra.mxu2 %v676_v3 }
  0x90   : > { %492 = vmatpush.msra.mxu0 %v469_v9  ;;  %1632 = vmatpush.msra.mxu3 %v469_v9  ;;  %v672_v9 = vld [vmem:[%s2572_s21 + $0x58] sm:$0xff] }
  0x91   : > { %585 = vmatpush.msra.mxu1 %v574_v33  ;;  %678 = vmatpush.msra.mxu2 %v675_v4 }
  0x92   : > { %493 = vmatpush.msra.mxu0 %v468_v10  ;;  %1633 = vmatpush.msra.mxu3 %v468_v10 }
  0x93   : > { %586 = vmatpush.msra.mxu1 %v573_v34  ;;  %679 = vmatpush.msra.mxu2 %v674_v5 }
  0x94   : > { %494 = vmatpush.msra.mxu0 %v467_v11  ;;  %1634 = vmatpush.msra.mxu3 %v467_v11 }
  0x95   : > { %587 = vmatpush.msra.mxu1 %v572_v35  ;;  %680 = vmatpush.msra.mxu2 %v673_v6 }
  0x96   : > { %495 = vmatpush.msra.mxu0 %v466_v12  ;;  %1635 = vmatpush.msra.mxu3 %v466_v12  ;;  %v671_v12 = vld [vmem:[%s2572_s21 + $0x50] sm:$0xff] }
  0x97   : > { %588 = vmatpush.msra.mxu1 %v571_v38  ;;  %681 = vmatpush.msra.mxu2 %v672_v9 }
  0x98   : > { %496 = vmatpush.msra.mxu0 %v465_v13  ;;  %1636 = vmatpush.msra.mxu3 %v465_v13  ;;  %v670_v13 = vld [vmem:[%s2572_s21 + $0x48] sm:$0xff] }
  0x99   : > { %589 = vmatpush.msra.mxu1 %v570_v39  ;;  %682 = vmatpush.msra.mxu2 %v671_v12 }
  0x9a   : > { %497 = vmatpush.msra.mxu0 %v464_v14  ;;  %1637 = vmatpush.msra.mxu3 %v464_v14  ;;  %v669_v14 = vld [vmem:[%s2572_s21 + $0x40] sm:$0xff] }
  0x9b   : > { %590 = vmatpush.msra.mxu1 %v569_v40  ;;  %683 = vmatpush.msra.mxu2 %v670_v13 }
  0x9c   : > { %498 = vmatpush.msra.mxu0 %v463_v15  ;;  %1638 = vmatpush.msra.mxu3 %v463_v15 }
  0x9d   : > { %499 = vmatmul.f32.vlgmr.msra.gmra.mxu0 %v447_v16  ;;  %535 = vmatmul.f32.vlgmr.msra.gmra.mxu3 %v459_v23 }
  0x9e   : > { %1639 = vmatpush.msrb.mxu3 %v579_v26  ;;  %591 = vmatpush.msra.mxu1 %v568_v41 }
  0x9f   : > { %684 = vmatpush.msra.mxu2 %v669_v14 }
  0xa0   : > { %1640 = vmatpush.msrb.mxu3 %v578_v27  ;;  %592 = vmatpush.msra.mxu1 %v567_v43 }
  0xa2   : > { %1641 = vmatpush.msrb.mxu3 %v577_v28  ;;  %593 = vmatpush.msra.mxu1 %v566_v44  ;;  %v663_v28 = vld [vmem:[%s2572_s21 + $0x10] sm:$0xff] }
  0xa4   : > { %1642 = vmatpush.msrb.mxu3 %v576_v29  ;;  %594 = vmatpush.msra.mxu1 %v565_v46  ;;  %v662_v29 = vld [vmem:[%s2572_s21 + $0x8] sm:$0xff] }
  0xa5   : > { %502 = vmatmul.f32.gmra.mxu0 %v448_v17  ;;  %538 = vmatmul.f32.gmra.mxu3 %v460_v25  ;;  %v668_v17 = vld [vmem:[%s2572_s21 + $0x38] sm:$0xff] }
  0xa6   : > { %1643 = vmatpush.msrb.mxu3 %v575_v32  ;;  %595 = vmatpush.msra.mxu1 %v564_v47  ;;  %v664_v25 = vld [vmem:[%s2572_s21 + $0x18] sm:$0xff]  ;;  %v661_v32 = vld [vmem:[%s2572_s21] sm:$0xff] }
  0xa7   : > { %685 = vmatpush.msra.mxu2 %v668_v17 }
  0xa8   : > { %1644 = vmatpush.msrb.mxu3 %v574_v33 }
  0xaa   : > { %1645 = vmatpush.msrb.mxu3 %v573_v34 }
  0xac   : > { %1646 = vmatpush.msrb.mxu3 %v572_v35 }
  0xad   : > { %505 = vmatmul.f32.gmra.mxu0 %v449_v18  ;;  %541 = vmatmul.f32.gmra.mxu3 %v461_v31 }
  0xae   : > { %1647 = vmatpush.msrb.mxu3 %v571_v38 }
  0xb0   : > { %1648 = vmatpush.msrb.mxu3 %v570_v39 }
  0xb2   : > { %1649 = vmatpush.msrb.mxu3 %v569_v40 }
  0xb4   : > { %1650 = vmatpush.msrb.mxu3 %v568_v41 }
  0xb5   : > { %508 = vmatmul.f32.gmra.mxu0 %v450_v19  ;;  %544 = vmatmul.f32.gmra.mxu3 %v462_v37 }
  0xb6   : > { %1651 = vmatpush.msrb.mxu3 %v567_v43 }
  0xb8   : > { %1652 = vmatpush.msrb.mxu3 %v566_v44 }
  0xba   : > { %1653 = vmatpush.msrb.mxu3 %v565_v46 }
  0xbc   : > { %1654 = vmatpush.msrb.mxu3 %v564_v47 }
  0xbd   : > { %511 = vmatmul.f32.gmra.mxu0 %v451_v20  ;;  %v667_v20 = vld [vmem:[%s2572_s21 + $0x30] sm:$0xff] }
  0xbe   : > { %1655 = vmatpush.msra.mxu3 %v676_v3  ;;  %686 = vmatpush.msra.mxu2 %v667_v20 }
  0xc0   : > { %1656 = vmatpush.msra.mxu3 %v675_v4 }
  0xc2   : > { %1657 = vmatpush.msra.mxu3 %v674_v5 }
  0xc4   : > { %1658 = vmatpush.msra.mxu3 %v673_v6 }
  0xc5   : > { %514 = vmatmul.f32.gmra.mxu0 %v452_v21  ;;  %v666_v21 = vld [vmem:[%s2572_s21 + $0x28] sm:$0xff] }
  0xc6   : > { %1659 = vmatpush.msra.mxu3 %v672_v9  ;;  %687 = vmatpush.msra.mxu2 %v666_v21 }
  0xc8   : > { %1660 = vmatpush.msra.mxu3 %v671_v12 }
  0xca   : > { %1661 = vmatpush.msra.mxu3 %v670_v13 }
  0xcc   : > { %1662 = vmatpush.msra.mxu3 %v669_v14 }
  0xcd   : > { %517 = vmatmul.f32.gmra.mxu0 %v453_v22  ;;  %v665_v22 = vld [vmem:[%s2572_s21 + $0x20] sm:$0xff] }
  0xce   : > { %1663 = vmatpush.msra.mxu3 %v668_v17  ;;  %688 = vmatpush.msra.mxu2 %v665_v22 }
  0xd0   : > { %1664 = vmatpush.msra.mxu3 %v667_v20  ;;  %689 = vmatpush.msra.mxu2 %v664_v25 }
  0xd2   : > { %1665 = vmatpush.msra.mxu3 %v666_v21  ;;  %690 = vmatpush.msra.mxu2 %v663_v28 }
  0xd4   : > { %1666 = vmatpush.msra.mxu3 %v665_v22  ;;  %691 = vmatpush.msra.mxu2 %v662_v29 }
  0xd5   : > { %520 = vmatmul.f32.gmra.mxu0 %v454_v24 }
  0xd6   : > { %1667 = vmatpush.msra.mxu3 %v664_v25  ;;  %692 = vmatpush.msra.mxu2 %v661_v32 }
  0xd8   : > { %1668 = vmatpush.msra.mxu3 %v663_v28 }
  0xda   : > { %1669 = vmatpush.msra.mxu3 %v662_v29 }
  0xdc   : > { %1670 = vmatpush.msra.mxu3 %v661_v32 }
  0xdd   : > { %523 = vmatmul.f32.gmra.mxu0 %v455_v30 }
  0xe5   : > { %526 = vmatmul.f32.gmra.mxu0 %v456_v36 }
  0xed   : > { %529 = vmatmul.f32.gmra.mxu0 %v457_v42 }
  0xf5   : > { %532 = vmatmul.f32.gmra.mxu0 %v458_v45 }
 0x11a   : > { %v500_v49 = vpop.f32.mrf.mxu0 }
 0x11b   : > { %v501_v50 = vadd.f32 %v2595_v48, %v500_v49 }
 0x11d   : > { %548 = vst [vmem:[#allocation2] sm:$0xff] %v501_v50  ;;  %596 = vmatmul.f32.vlgmr.msra.gmra.mxu1 %v501_v50 }
 0x120   : > { %v536_v1 = vpop.f32.mrf.mxu3 }
 0x121   : > { %v537_v2 = vadd.f32 %v2595_v48, %v536_v1 }
 0x122   : > { %v503_v51 = vpop.f32.mrf.mxu0 }
 0x123   : > { %v504_v52 = vadd.f32 %v2595_v48, %v503_v51  ;;  %560 = vst [vmem:[#allocation2 + $0x60] sm:$0xff] %v537_v2  ;;  %632 = vmatmul.f32.vlgmr.msrb.gmra.mxu3 %v537_v2 }
 0x125   : > { %549 = vst [vmem:[#allocation2 + $0x8] sm:$0xff] %v504_v52  ;;  %599 = vmatmul.f32.gmra.mxu1 %v504_v52 }
 0x128   : > { %v539_v10 = vpop.f32.mrf.mxu3 }
 0x129   : > { %v540_v11 = vadd.f32 %v2595_v48, %v539_v10 }
 0x12a   : > { %v506_v53 = vpop.f32.mrf.mxu0 }
 0x12b   : > { %v507_v54 = vadd.f32 %v2595_v48, %v506_v53  ;;  %561 = vst [vmem:[#allocation2 + $0x68] sm:$0xff] %v540_v11  ;;  %635 = vmatmul.f32.gmra.mxu3 %v540_v11 }
 0x12d   : > { %550 = vst [vmem:[#allocation2 + $0x10] sm:$0xff] %v507_v54  ;;  %602 = vmatmul.f32.gmra.mxu1 %v507_v54 }
 0x130   : > { %v542_v18 = vpop.f32.mrf.mxu3 }
 0x131   : > { %v543_v19 = vadd.f32 %v2595_v48, %v542_v18 }
 0x132   : > { %v509_v55 = vpop.f32.mrf.mxu0 }
 0x133   : > { %v510_v56 = vadd.f32 %v2595_v48, %v509_v55  ;;  %562 = vst [vmem:[#allocation2 + $0x70] sm:$0xff] %v543_v19  ;;  %638 = vmatmul.f32.gmra.mxu3 %v543_v19 }
 0x135   : > { %551 = vst [vmem:[#allocation2 + $0x18] sm:$0xff] %v510_v56  ;;  %605 = vmatmul.f32.gmra.mxu1 %v510_v56 }
 0x138   : > { %v545_v26 = vpop.f32.mrf.mxu3 }
 0x139   : > { %v546_v27 = vadd.f32 %v2595_v48, %v545_v26 }
 0x13a   : > { %v512_v57 = vpop.f32.mrf.mxu0 }
 0x13b   : > { %v513_v58 = vadd.f32 %v2595_v48, %v512_v57  ;;  %563 = vst [vmem:[#allocation2 + $0x78] sm:$0xff] %v546_v27  ;;  %641 = vmatmul.f32.gmra.mxu3 %v546_v27 }
 0x13d   : > { %552 = vst [vmem:[#allocation2 + $0x20] sm:$0xff] %v513_v58  ;;  %608 = vmatmul.f32.gmra.mxu1 %v513_v58 }
 0x142   : > { %v515_v59 = vpop.f32.mrf.mxu0 }
 0x143   : > { %v516_v60 = vadd.f32 %v2595_v48, %v515_v59 }
 0x145   : > { %553 = vst [vmem:[#allocation2 + $0x28] sm:$0xff] %v516_v60  ;;  %611 = vmatmul.f32.gmra.mxu1 %v516_v60 }
 0x14a   : > { %v518_v61 = vpop.f32.mrf.mxu0 }
 0x14b   : > { %v519_v62 = vadd.f32 %v2595_v48, %v518_v61 }
 0x14d   : > { %554 = vst [vmem:[#allocation2 + $0x30] sm:$0xff] %v519_v62  ;;  %614 = vmatmul.f32.gmra.mxu1 %v519_v62 }
 0x152   : > { %v521_v63 = vpop.f32.mrf.mxu0 }
 0x153   : > { %v522_v0 = vadd.f32 %v2595_v48, %v521_v63 }
 0x155   : > { %555 = vst [vmem:[#allocation2 + $0x38] sm:$0xff] %v522_v0  ;;  %617 = vmatmul.f32.gmra.mxu1 %v522_v0 }
 0x15a   : > { %v524_v7 = vpop.f32.mrf.mxu0 }
 0x15b   : > { %v525_v8 = vadd.f32 %v2595_v48, %v524_v7 }
 0x15d   : > { %556 = vst [vmem:[#allocation2 + $0x40] sm:$0xff] %v525_v8  ;;  %620 = vmatmul.f32.gmra.mxu1 %v525_v8 }
 0x162   : > { %v527_v15 = vpop.f32.mrf.mxu0 }
 0x163   : > { %v528_v16 = vadd.f32 %v2595_v48, %v527_v15 }
 0x165   : > { %557 = vst [vmem:[#allocation2 + $0x48] sm:$0xff] %v528_v16  ;;  %623 = vmatmul.f32.gmra.mxu1 %v528_v16 }
 0x16a   : > { %v530_v23 = vpop.f32.mrf.mxu0 }
 0x16b   : > { %v531_v24 = vadd.f32 %v2595_v48, %v530_v23 }
 0x16d   : > { %558 = vst [vmem:[#allocation2 + $0x50] sm:$0xff] %v531_v24  ;;  %626 = vmatmul.f32.gmra.mxu1 %v531_v24 }
 0x172   : > { %v533_v30 = vpop.f32.mrf.mxu0 }
 0x173   : > { %v534_v31 = vadd.f32 %v2595_v48, %v533_v30 }
 0x175   : > { %559 = vst [vmem:[#allocation2 + $0x58] sm:$0xff] %v534_v31  ;;  %629 = vmatmul.f32.gmra.mxu1 %v534_v31 }
 0x19a   : > { %v597_v33 = vpop.f32.mrf.mxu1 }
 0x19b   : > { %645 = vst [vmem:[#allocation4 + $0x30] sm:$0xff] %v597_v33  ;;  %693 = vmatmul.f32.vlgmr.msra.gmra.mxu2 %v597_v33 }
 0x1a2   : > { %v600_v34 = vpop.f32.mrf.mxu1 }
 0x1a3   : > { %646 = vst [vmem:[#allocation4] sm:$0xff] %v600_v34  ;;  %696 = vmatmul.f32.gmra.mxu2 %v600_v34 }
 0x1a6   : > { %v633_v42 = vpop.f32.mrf.mxu3 }
 0x1a7   : > { %729 = vmatmul.f32.vlgmr.msra.gmra.mxu3 %v633_v42  ;;  %657 = vst [vmem:[#allocation4 + $0x60] sm:$0xff] %v633_v42 }
 0x1aa   : > { %v603_v35 = vpop.f32.mrf.mxu1 }
 0x1ab   : > { %647 = vst [vmem:[#allocation4 + $0x58] sm:$0xff] %v603_v35  ;;  %699 = vmatmul.f32.gmra.mxu2 %v603_v35 }
 0x1ae   : > { %v636_v44 = vpop.f32.mrf.mxu3 }
 0x1af   : > { %732 = vmatmul.f32.gmra.mxu3 %v636_v44  ;;  %658 = vst [vmem:[#allocation4 + $0x70] sm:$0xff] %v636_v44 }
 0x1b2   : > { %v606_v36 = vpop.f32.mrf.mxu1 }
 0x1b3   : > { %648 = vst [vmem:[#allocation4 + $0x18] sm:$0xff] %v606_v36  ;;  %702 = vmatmul.f32.gmra.mxu2 %v606_v36 }
 0x1b6   : > { %v639_v46 = vpop.f32.mrf.mxu3 }
 0x1b7   : > { %735 = vmatmul.f32.gmra.mxu3 %v639_v46  ;;  %659 = vst [vmem:[#allocation4 + $0x78] sm:$0xff] %v639_v46 }
 0x1ba   : > { %v609_v37 = vpop.f32.mrf.mxu1 }
 0x1bb   : > { %649 = vst [vmem:[#allocation4 + $0x50] sm:$0xff] %v609_v37  ;;  %705 = vmatmul.f32.gmra.mxu2 %v609_v37 }
 0x1be   : > { %v642_v48 = vpop.f32.mrf.mxu3 }
 0x1bf   : > { %738 = vmatmul.f32.gmra.mxu3 %v642_v48  ;;  %660 = vst [vmem:[#allocation4 + $0x28] sm:$0xff] %v642_v48 }
 0x1c2   : > { %v612_v38 = vpop.f32.mrf.mxu1 }
 0x1c3   : > { %650 = vst [vmem:[#allocation4 + $0x68] sm:$0xff] %v612_v38  ;;  %708 = vmatmul.f32.gmra.mxu2 %v612_v38 }
 0x1ca   : > { %v615_v39 = vpop.f32.mrf.mxu1 }
 0x1cb   : > { %651 = vst [vmem:[#allocation4 + $0x8] sm:$0xff] %v615_v39  ;;  %711 = vmatmul.f32.gmra.mxu2 %v615_v39 }
 0x1d2   : > { %v618_v40 = vpop.f32.mrf.mxu1 }
 0x1d3   : > { %652 = vst [vmem:[#allocation4 + $0x48] sm:$0xff] %v618_v40  ;;  %714 = vmatmul.f32.gmra.mxu2 %v618_v40 }
 0x1da   : > { %v621_v41 = vpop.f32.mrf.mxu1 }
 0x1db   : > { %653 = vst [vmem:[#allocation4 + $0x40] sm:$0xff] %v621_v41  ;;  %717 = vmatmul.f32.gmra.mxu2 %v621_v41 }
 0x1e2   : > { %v624_v43 = vpop.f32.mrf.mxu1 }
 0x1e3   : > { %654 = vst [vmem:[#allocation4 + $0x20] sm:$0xff] %v624_v43  ;;  %720 = vmatmul.f32.gmra.mxu2 %v624_v43 }
 0x1ea   : > { %v627_v45 = vpop.f32.mrf.mxu1 }
 0x1eb   : > { %655 = vst [vmem:[#allocation4 + $0x10] sm:$0xff] %v627_v45  ;;  %723 = vmatmul.f32.gmra.mxu2 %v627_v45 }
 0x1f2   : > { %v630_v47 = vpop.f32.mrf.mxu1 }
 0x1f3   : > { %656 = vst [vmem:[#allocation4 + $0x38] sm:$0xff] %v630_v47  ;;  %726 = vmatmul.f32.gmra.mxu2 %v630_v47 }
 0x21e   : > { %v694_v49 = vpop.f32.mrf.mxu2 }
 0x21f   : > { %742 = vst [vmem:[#allocation5] sm:$0xff] %v694_v49  ;;  %758 = vxpose.xlu0.b32.start [1/16] %v694_v49, 128 }
 0x226   : > { %v697_v50 = vpop.f32.mrf.mxu2 }
 0x227   : > { %743 = vst [vmem:[#allocation5 + $0x8] sm:$0xff] %v697_v50  ;;  %759 = vxpose.xlu0.b32.cont [2/16] %v697_v50, 128 }
 0x22a   : > { %v730_v58 = vpop.f32.mrf.mxu3 }
 0x22b   : > { %754 = vst [vmem:[#allocation5 + $0x60] sm:$0xff] %v730_v58 }
 0x22e   : > { %v700_v51 = vpop.f32.mrf.mxu2 }
 0x22f   : > { %744 = vst [vmem:[#allocation5 + $0x10] sm:$0xff] %v700_v51  ;;  %760 = vxpose.xlu0.b32.cont [3/16] %v700_v51, 128 }
 0x232   : > { %v733_v60 = vpop.f32.mrf.mxu3 }
 0x233   : > { %755 = vst [vmem:[#allocation5 + $0x68] sm:$0xff] %v733_v60 }
 0x236   : > { %v703_v52 = vpop.f32.mrf.mxu2 }
 0x237   : > { %745 = vst [vmem:[#allocation5 + $0x18] sm:$0xff] %v703_v52  ;;  %761 = vxpose.xlu0.b32.cont [4/16] %v703_v52, 128 }
 0x23a   : > { %v736_v62 = vpop.f32.mrf.mxu3 }
 0x23b   : > { %756 = vst [vmem:[#allocation5 + $0x70] sm:$0xff] %v736_v62 }
 0x23e   : > { %v706_v53 = vpop.f32.mrf.mxu2 }
 0x23f   : > { %746 = vst [vmem:[#allocation5 + $0x20] sm:$0xff] %v706_v53  ;;  %762 = vxpose.xlu0.b32.cont [5/16] %v706_v53, 128 }
 0x242   : > { %v739_v0 = vpop.f32.mrf.mxu3 }
 0x243   : > { %757 = vst [vmem:[#allocation5 + $0x78] sm:$0xff] %v739_v0 }
 0x246   : > { %v709_v54 = vpop.f32.mrf.mxu2 }
 0x247   : > { %747 = vst [vmem:[#allocation5 + $0x28] sm:$0xff] %v709_v54  ;;  %763 = vxpose.xlu0.b32.cont [6/16] %v709_v54, 128 }
 0x24e   : > { %v712_v55 = vpop.f32.mrf.mxu2 }
 0x24f   : > { %748 = vst [vmem:[#allocation5 + $0x30] sm:$0xff] %v712_v55  ;;  %764 = vxpose.xlu0.b32.cont [7/16] %v712_v55, 128 }
 0x256   : > { %v715_v56 = vpop.f32.mrf.mxu2 }
 0x257   : > { %749 = vst [vmem:[#allocation5 + $0x38] sm:$0xff] %v715_v56  ;;  %765 = vxpose.xlu0.b32.cont [8/16] %v715_v56, 128 }
 0x25e   : > { %v718_v57 = vpop.f32.mrf.mxu2 }
 0x25f   : > { %750 = vst [vmem:[#allocation5 + $0x40] sm:$0xff] %v718_v57  ;;  %766 = vxpose.xlu0.b32.cont [9/16] %v718_v57, 128 }
 0x266   : > { %v721_v59 = vpop.f32.mrf.mxu2 }
 0x267   : > { %751 = vst [vmem:[#allocation5 + $0x48] sm:$0xff] %v721_v59  ;;  %767 = vxpose.xlu0.b32.cont [10/16] %v721_v59, 128 }
 0x26e   : > { %v724_v61 = vpop.f32.mrf.mxu2 }
 0x26f   : > { %752 = vst [vmem:[#allocation5 + $0x50] sm:$0xff] %v724_v61  ;;  %768 = vxpose.xlu0.b32.cont [11/16] %v724_v61, 128 }
 0x276   : > { %v727_v63 = vpop.f32.mrf.mxu2 }
 0x277   : > { %753 = vst [vmem:[#allocation5 + $0x58] sm:$0xff] %v727_v63  ;;  %769 = vxpose.xlu0.b32.cont [12/16] %v727_v63, 128 }
 0x27f   : > { %770 = vxpose.xlu0.b32.cont [13/16] %v730_v58, 128 }
 0x287   : > { %771 = vxpose.xlu0.b32.cont [14/16] %v733_v60, 128 }
 0x28f   : > { %772 = vxpose.xlu0.b32.cont [15/16] %v736_v62, 128 }
 0x297   : > { %773 = vxpose.xlu0.b32.end [16/16] %v739_v0, 128 }
 0x2c3   : > { %v774_v1 = vpop.trf.xlu0 }
 0x2c4   : > { %790 = vst [vmem:[#allocation6] sm:$0xff] %v774_v1 }
 0x2cb   : > { %v775_v2 = vpop.trf.xlu0 }
 0x2d3   : > { %v776_v3 = vpop.trf.xlu0 }
 0x2db   : > { %v777_v4 = vpop.trf.xlu0 }
 0x2e3   : > { %v778_v5 = vpop.trf.xlu0 }
 0x2eb   : > { %v779_v6 = vpop.trf.xlu0 }
 0x2f3   : > { %v780_v7 = vpop.trf.xlu0 }
 0x2fb   : > { %v781_v8 = vpop.trf.xlu0 }
 0x303   : > { %v782_v9 = vpop.trf.xlu0 }
 0x30b   : > { %v783_v10 = vpop.trf.xlu0 }
 0x313   : > { %v784_v11 = vpop.trf.xlu0 }
 0x31b   : > { %v785_v12 = vpop.trf.xlu0 }
 0x323   : > { %v786_v13 = vpop.trf.xlu0 }
 0x32b   : > { %v787_v14 = vpop.trf.xlu0 }
 0x333   : > { %v788_v15 = vpop.trf.xlu0 }
 0x33b   : > { %v789_v16 = vpop.trf.xlu0 }
 0x33c PF: > { %s2919_s11 = sld [smem:[#allocation27_spill]] }
 0x342   : > { %p806_p5 = scmp.eq.s32.totalorder %s2919_s11, 1 }
 0x344   : > { %p807_p13 = pnand %p806_p5, %p442_p2 }
 0x346   : > { %810 = sbr.rel (%p807_p13) target bundleno = 1412 (0x584), region = 76 }
 0x34b   : > { %v842_v17 = vld [vmem:[%s2548_s22 + $0x78] sm:$0xff]  ;;  %v841_v18 = vld [vmem:[%s2548_s22 + $0x70] sm:$0xff]  ;;  %v840_v19 = vld [vmem:[%s2548_s22 + $0x68] sm:$0xff] }
 0x34c   : > { %843 = vmatpush.msra.mxu0 %v842_v17  ;;  %1671 = vmatpush.msra.mxu2 %v842_v17  ;;  %v839_v20 = vld [vmem:[%s2548_s22 + $0x60] sm:$0xff]  ;;  %v838_v21 = vld [vmem:[%s2548_s22 + $0x58] sm:$0xff]  ;;  %v837_v22 = vld [vmem:[%s2548_s22 + $0x50] sm:$0xff] }
 0x34d   : > { %v836_v23 = vld [vmem:[%s2548_s22 + $0x48] sm:$0xff]  ;;  %v835_v24 = vld [vmem:[%s2548_s22 + $0x40] sm:$0xff]  ;;  %v834_v25 = vld [vmem:[%s2548_s22 + $0x38] sm:$0xff] }
 0x34e   : > { %844 = vmatpush.msra.mxu0 %v841_v18  ;;  %1672 = vmatpush.msra.mxu2 %v841_v18  ;;  %v833_v26 = vld [vmem:[%s2548_s22 + $0x30] sm:$0xff]  ;;  %v832_v27 = vld [vmem:[%s2548_s22 + $0x28] sm:$0xff]  ;;  %v831_v28 = vld [vmem:[%s2548_s22 + $0x20] sm:$0xff] }
 0x34f   : > { %v830_v29 = vld [vmem:[%s2548_s22 + $0x18] sm:$0xff]  ;;  %v829_v30 = vld [vmem:[%s2548_s22 + $0x10] sm:$0xff]  ;;  %v828_v31 = vld [vmem:[%s2548_s22 + $0x8] sm:$0xff] }
 0x350   : > { %845 = vmatpush.msra.mxu0 %v840_v19  ;;  %1673 = vmatpush.msra.mxu2 %v840_v19  ;;  %v827_v32 = vld [vmem:[%s2548_s22] sm:$0xff]  ;;  %v811_v33 = vld [vmem:[#allocation3] sm:$0xff]  ;;  %v812_v34 = vld [vmem:[#allocation3 + $0x8] sm:$0xff] }
 0x351   : > { %v813_v35 = vld [vmem:[#allocation3 + $0x10] sm:$0xff]  ;;  %v819_v36 = vld [vmem:[#allocation3 + $0x40] sm:$0xff]  ;;  %v814_v37 = vld [vmem:[#allocation3 + $0x18] sm:$0xff] }
 0x352   : > { %846 = vmatpush.msra.mxu0 %v839_v20  ;;  %1674 = vmatpush.msra.mxu2 %v839_v20  ;;  %v820_v38 = vld [vmem:[#allocation3 + $0x48] sm:$0xff]  ;;  %v938_v40 = vld [vmem:[%s2572_s21 + $0x70] sm:$0xff]  ;;  %v937_v41 = vld [vmem:[%s2572_s21 + $0x68] sm:$0xff] }
 0x353   : > { %v939_v39 = vld [vmem:[%s2572_s21 + $0x78] sm:$0xff]  ;;  %v815_v42 = vld [vmem:[#allocation3 + $0x20] sm:$0xff]  ;;  %v821_v43 = vld [vmem:[#allocation3 + $0x50] sm:$0xff] }
 0x354   : > { %847 = vmatpush.msra.mxu0 %v838_v21  ;;  %1675 = vmatpush.msra.mxu2 %v838_v21  ;;  %v936_v44 = vld [vmem:[%s2572_s21 + $0x60] sm:$0xff]  ;;  %v935_v45 = vld [vmem:[%s2572_s21 + $0x58] sm:$0xff]  ;;  %v934_v46 = vld [vmem:[%s2572_s21 + $0x50] sm:$0xff] }
 0x355   : > { %940 = vmatpush.msra.mxu1 %v939_v39  ;;  %1687 = vmatpush.msra.mxu3 %v939_v39  ;;  %v816_v47 = vld [vmem:[#allocation3 + $0x28] sm:$0xff]  ;;  %v933_v48 = vld [vmem:[%s2572_s21 + $0x48] sm:$0xff]  ;;  %v932_v50 = vld [vmem:[%s2572_s21 + $0x40] sm:$0xff] }
 0x356   : > { %848 = vmatpush.msra.mxu0 %v837_v22  ;;  %1676 = vmatpush.msra.mxu2 %v837_v22  ;;  %v822_v49 = vld [vmem:[#allocation3 + $0x58] sm:$0xff]  ;;  %v931_v51 = vld [vmem:[%s2572_s21 + $0x38] sm:$0xff]  ;;  %v930_v52 = vld [vmem:[%s2572_s21 + $0x30] sm:$0xff] }
 0x357   : > { %941 = vmatpush.msra.mxu1 %v938_v40  ;;  %1688 = vmatpush.msra.mxu3 %v938_v40  ;;  %v817_v53 = vld [vmem:[#allocation3 + $0x30] sm:$0xff]  ;;  %v929_v54 = vld [vmem:[%s2572_s21 + $0x28] sm:$0xff]  ;;  %v823_v55 = vld [vmem:[#allocation3 + $0x60] sm:$0xff] }
 0x358   : > { %849 = vmatpush.msra.mxu0 %v836_v23  ;;  %1677 = vmatpush.msra.mxu2 %v836_v23  ;;  %v928_v56 = vld [vmem:[%s2572_s21 + $0x20] sm:$0xff]  ;;  %v927_v57 = vld [vmem:[%s2572_s21 + $0x18] sm:$0xff]  ;;  %v926_v58 = vld [vmem:[%s2572_s21 + $0x10] sm:$0xff] }
 0x359   : > { %942 = vmatpush.msra.mxu1 %v937_v41  ;;  %1689 = vmatpush.msra.mxu3 %v937_v41  ;;  %v818_v59 = vld [vmem:[#allocation3 + $0x38] sm:$0xff]  ;;  %v824_v61 = vld [vmem:[#allocation3 + $0x68] sm:$0xff]  ;;  %v825_v62 = vld [vmem:[#allocation3 + $0x70] sm:$0xff] }
 0x35a   : > { %850 = vmatpush.msra.mxu0 %v835_v24  ;;  %1678 = vmatpush.msra.mxu2 %v835_v24  ;;  %v925_v60 = vld [vmem:[%s2572_s21 + $0x8] sm:$0xff]  ;;  %v924_v0 = vld [vmem:[%s2572_s21] sm:$0xff] }
 0x35b   : > { %943 = vmatpush.msra.mxu1 %v936_v44  ;;  %1690 = vmatpush.msra.mxu3 %v936_v44  ;;  %v826_v63 = vld [vmem:[#allocation3 + $0x78] sm:$0xff] }
 0x35c   : > { %851 = vmatpush.msra.mxu0 %v834_v25  ;;  %1679 = vmatpush.msra.mxu2 %v834_v25 }
 0x35d   : > { %944 = vmatpush.msra.mxu1 %v935_v45  ;;  %1691 = vmatpush.msra.mxu3 %v935_v45 }
 0x35e   : > { %852 = vmatpush.msra.mxu0 %v833_v26  ;;  %1680 = vmatpush.msra.mxu2 %v833_v26 }
 0x35f   : > { %945 = vmatpush.msra.mxu1 %v934_v46  ;;  %1692 = vmatpush.msra.mxu3 %v934_v46 }
 0x360   : > { %853 = vmatpush.msra.mxu0 %v832_v27  ;;  %1681 = vmatpush.msra.mxu2 %v832_v27 }
 0x361   : > { %946 = vmatpush.msra.mxu1 %v933_v48  ;;  %1693 = vmatpush.msra.mxu3 %v933_v48 }
 0x362   : > { %854 = vmatpush.msra.mxu0 %v831_v28  ;;  %1682 = vmatpush.msra.mxu2 %v831_v28 }
 0x363   : > { %947 = vmatpush.msra.mxu1 %v932_v50  ;;  %1694 = vmatpush.msra.mxu3 %v932_v50 }
 0x364   : > { %855 = vmatpush.msra.mxu0 %v830_v29  ;;  %1683 = vmatpush.msra.mxu2 %v830_v29 }
 0x365   : > { %948 = vmatpush.msra.mxu1 %v931_v51  ;;  %1695 = vmatpush.msra.mxu3 %v931_v51 }
 0x366   : > { %856 = vmatpush.msra.mxu0 %v829_v30  ;;  %1684 = vmatpush.msra.mxu2 %v829_v30 }
 0x367   : > { %949 = vmatpush.msra.mxu1 %v930_v52  ;;  %1696 = vmatpush.msra.mxu3 %v930_v52 }
 0x368   : > { %857 = vmatpush.msra.mxu0 %v828_v31  ;;  %1685 = vmatpush.msra.mxu2 %v828_v31 }
 0x369   : > { %950 = vmatpush.msra.mxu1 %v929_v54  ;;  %1697 = vmatpush.msra.mxu3 %v929_v54 }
 0x36a   : > { %858 = vmatpush.msra.mxu0 %v827_v32  ;;  %1686 = vmatpush.msra.mxu2 %v827_v32 }
 0x36b   : > { %859 = vmatmul.f32.vlgmr.msra.gmra.mxu0 %v811_v33  ;;  %883 = vmatmul.f32.vlgmr.msra.gmra.mxu2 %v819_v36 }
 0x36c   : > { %951 = vmatpush.msra.mxu1 %v928_v56  ;;  %1698 = vmatpush.msra.mxu3 %v928_v56 }
 0x36e   : > { %952 = vmatpush.msra.mxu1 %v927_v57  ;;  %1699 = vmatpush.msra.mxu3 %v927_v57 }
 0x370   : > { %953 = vmatpush.msra.mxu1 %v926_v58  ;;  %1700 = vmatpush.msra.mxu3 %v926_v58 }
 0x372   : > { %954 = vmatpush.msra.mxu1 %v925_v60  ;;  %1701 = vmatpush.msra.mxu3 %v925_v60 }
 0x373   : > { %862 = vmatmul.f32.gmra.mxu0 %v812_v34  ;;  %886 = vmatmul.f32.gmra.mxu2 %v820_v38 }
 0x374   : > { %955 = vmatpush.msra.mxu1 %v924_v0  ;;  %1702 = vmatpush.msra.mxu3 %v924_v0 }
 0x37b   : > { %865 = vmatmul.f32.gmra.mxu0 %v813_v35  ;;  %889 = vmatmul.f32.gmra.mxu2 %v821_v43 }
 0x383   : > { %868 = vmatmul.f32.gmra.mxu0 %v814_v37  ;;  %892 = vmatmul.f32.gmra.mxu2 %v822_v49 }
 0x38b   : > { %871 = vmatmul.f32.gmra.mxu0 %v815_v42  ;;  %895 = vmatmul.f32.gmra.mxu2 %v823_v55 }
 0x393   : > { %874 = vmatmul.f32.gmra.mxu0 %v816_v47  ;;  %898 = vmatmul.f32.gmra.mxu2 %v824_v61 }
 0x39b   : > { %877 = vmatmul.f32.gmra.mxu0 %v817_v53  ;;  %901 = vmatmul.f32.gmra.mxu2 %v825_v62 }
 0x3a3   : > { %880 = vmatmul.f32.gmra.mxu0 %v818_v59  ;;  %904 = vmatmul.f32.gmra.mxu2 %v826_v63 }
 0x3e8   : > { %v860_v1 = vpop.f32.mrf.mxu0 }
 0x3e9   : > { %908 = vst [vmem:[#allocation4 + $0x30] sm:$0xff] %v860_v1  ;;  %956 = vmatmul.f32.vlgmr.msra.gmra.mxu1 %v860_v1 }
 0x3ee   : > { %v884_v5 = vpop.f32.mrf.mxu2 }
 0x3ef   : > { %916 = vst [vmem:[#allocation4 + $0x40] sm:$0xff] %v884_v5  ;;  %980 = vmatmul.f32.vlgmr.msra.gmra.mxu3 %v884_v5 }
 0x3f0   : > { %v863_v2 = vpop.f32.mrf.mxu0 }
 0x3f1   : > { %909 = vst [vmem:[#allocation4] sm:$0xff] %v863_v2  ;;  %959 = vmatmul.f32.gmra.mxu1 %v863_v2 }
 0x3f6   : > { %v887_v7 = vpop.f32.mrf.mxu2 }
 0x3f7   : > { %917 = vst [vmem:[#allocation4 + $0x20] sm:$0xff] %v887_v7  ;;  %983 = vmatmul.f32.gmra.mxu3 %v887_v7 }
 0x3f8   : > { %v866_v3 = vpop.f32.mrf.mxu0 }
 0x3f9   : > { %910 = vst [vmem:[#allocation4 + $0x58] sm:$0xff] %v866_v3  ;;  %962 = vmatmul.f32.gmra.mxu1 %v866_v3 }
 0x3fe   : > { %v890_v9 = vpop.f32.mrf.mxu2 }
 0x3ff   : > { %918 = vst [vmem:[#allocation4 + $0x10] sm:$0xff] %v890_v9  ;;  %986 = vmatmul.f32.gmra.mxu3 %v890_v9 }
 0x400   : > { %v869_v4 = vpop.f32.mrf.mxu0 }
 0x401   : > { %911 = vst [vmem:[#allocation4 + $0x18] sm:$0xff] %v869_v4  ;;  %965 = vmatmul.f32.gmra.mxu1 %v869_v4 }
 0x406   : > { %v893_v11 = vpop.f32.mrf.mxu2 }
 0x407   : > { %919 = vst [vmem:[#allocation4 + $0x38] sm:$0xff] %v893_v11  ;;  %989 = vmatmul.f32.gmra.mxu3 %v893_v11 }
 0x408   : > { %v872_v6 = vpop.f32.mrf.mxu0 }
 0x409   : > { %912 = vst [vmem:[#allocation4 + $0x50] sm:$0xff] %v872_v6  ;;  %968 = vmatmul.f32.gmra.mxu1 %v872_v6 }
 0x40e   : > { %v896_v13 = vpop.f32.mrf.mxu2 }
 0x40f   : > { %920 = vst [vmem:[#allocation4 + $0x60] sm:$0xff] %v896_v13  ;;  %992 = vmatmul.f32.gmra.mxu3 %v896_v13 }
 0x410   : > { %v875_v8 = vpop.f32.mrf.mxu0 }
 0x411   : > { %913 = vst [vmem:[#allocation4 + $0x68] sm:$0xff] %v875_v8  ;;  %971 = vmatmul.f32.gmra.mxu1 %v875_v8 }
 0x416   : > { %v899_v14 = vpop.f32.mrf.mxu2 }
 0x417   : > { %921 = vst [vmem:[#allocation4 + $0x70] sm:$0xff] %v899_v14  ;;  %995 = vmatmul.f32.gmra.mxu3 %v899_v14 }
 0x418   : > { %v878_v10 = vpop.f32.mrf.mxu0 }
 0x419   : > { %914 = vst [vmem:[#allocation4 + $0x8] sm:$0xff] %v878_v10  ;;  %974 = vmatmul.f32.gmra.mxu1 %v878_v10 }
 0x41e   : > { %v902_v15 = vpop.f32.mrf.mxu2 }
 0x41f   : > { %922 = vst [vmem:[#allocation4 + $0x78] sm:$0xff] %v902_v15  ;;  %998 = vmatmul.f32.gmra.mxu3 %v902_v15 }
 0x420   : > { %v881_v12 = vpop.f32.mrf.mxu0 }
 0x421   : > { %915 = vst [vmem:[#allocation4 + $0x48] sm:$0xff] %v881_v12  ;;  %977 = vmatmul.f32.gmra.mxu1 %v881_v12 }
 0x426   : > { %v905_v16 = vpop.f32.mrf.mxu2 }
 0x427   : > { %923 = vst [vmem:[#allocation4 + $0x28] sm:$0xff] %v905_v16  ;;  %1001 = vmatmul.f32.gmra.mxu3 %v905_v16 }
 0x466   : > { %v957_v17 = vpop.f32.mrf.mxu1 }
 0x467   : > { %1005 = vst [vmem:[#allocation5] sm:$0xff] %v957_v17  ;;  %1021 = vxpose.xlu0.b32.start [1/16] %v957_v17, 128 }
 0x46e   : > { %v960_v18 = vpop.f32.mrf.mxu1 }
 0x46f   : > { %1006 = vst [vmem:[#allocation5 + $0x8] sm:$0xff] %v960_v18  ;;  %1022 = vxpose.xlu0.b32.cont [2/16] %v960_v18, 128 }
 0x472   : > { %v981_v21 = vpop.f32.mrf.mxu3 }
 0x473   : > { %1013 = vst [vmem:[#allocation5 + $0x40] sm:$0xff] %v981_v21 }
 0x476   : > { %v963_v19 = vpop.f32.mrf.mxu1 }
 0x477   : > { %1007 = vst [vmem:[#allocation5 + $0x10] sm:$0xff] %v963_v19  ;;  %1023 = vxpose.xlu0.b32.cont [3/16] %v963_v19, 128 }
 0x47a   : > { %v984_v23 = vpop.f32.mrf.mxu3 }
 0x47b   : > { %1014 = vst [vmem:[#allocation5 + $0x48] sm:$0xff] %v984_v23 }
 0x47e   : > { %v966_v20 = vpop.f32.mrf.mxu1 }
 0x47f   : > { %1008 = vst [vmem:[#allocation5 + $0x18] sm:$0xff] %v966_v20  ;;  %1024 = vxpose.xlu0.b32.cont [4/16] %v966_v20, 128 }
 0x482   : > { %v987_v25 = vpop.f32.mrf.mxu3 }
 0x483   : > { %1015 = vst [vmem:[#allocation5 + $0x50] sm:$0xff] %v987_v25 }
 0x486   : > { %v969_v22 = vpop.f32.mrf.mxu1 }
 0x487   : > { %1009 = vst [vmem:[#allocation5 + $0x20] sm:$0xff] %v969_v22  ;;  %1025 = vxpose.xlu0.b32.cont [5/16] %v969_v22, 128 }
 0x48a   : > { %v990_v27 = vpop.f32.mrf.mxu3 }
 0x48b   : > { %1016 = vst [vmem:[#allocation5 + $0x58] sm:$0xff] %v990_v27 }
 0x48e   : > { %v972_v24 = vpop.f32.mrf.mxu1 }
 0x48f   : > { %1010 = vst [vmem:[#allocation5 + $0x28] sm:$0xff] %v972_v24  ;;  %1026 = vxpose.xlu0.b32.cont [6/16] %v972_v24, 128 }
 0x492   : > { %v993_v29 = vpop.f32.mrf.mxu3 }
 0x493   : > { %1017 = vst [vmem:[#allocation5 + $0x60] sm:$0xff] %v993_v29 }
 0x496   : > { %v975_v26 = vpop.f32.mrf.mxu1 }
 0x497   : > { %1011 = vst [vmem:[#allocation5 + $0x30] sm:$0xff] %v975_v26  ;;  %1027 = vxpose.xlu0.b32.cont [7/16] %v975_v26, 128 }
 0x49a   : > { %v996_v30 = vpop.f32.mrf.mxu3 }
 0x49b   : > { %1018 = vst [vmem:[#allocation5 + $0x68] sm:$0xff] %v996_v30 }
 0x49e   : > { %v978_v28 = vpop.f32.mrf.mxu1 }
 0x49f   : > { %1012 = vst [vmem:[#allocation5 + $0x38] sm:$0xff] %v978_v28  ;;  %1028 = vxpose.xlu0.b32.cont [8/16] %v978_v28, 128 }
 0x4a2   : > { %v999_v31 = vpop.f32.mrf.mxu3 }
 0x4a3   : > { %1019 = vst [vmem:[#allocation5 + $0x70] sm:$0xff] %v999_v31 }
 0x4a7   : > { %1029 = vxpose.xlu0.b32.cont [9/16] %v981_v21, 128 }
 0x4aa   : > { %v1002_v32 = vpop.f32.mrf.mxu3 }
 0x4ab   : > { %1020 = vst [vmem:[#allocation5 + $0x78] sm:$0xff] %v1002_v32 }
 0x4af   : > { %1030 = vxpose.xlu0.b32.cont [10/16] %v984_v23, 128 }
 0x4b7   : > { %1031 = vxpose.xlu0.b32.cont [11/16] %v987_v25, 128 }
 0x4bf   : > { %1032 = vxpose.xlu0.b32.cont [12/16] %v990_v27, 128 }
 0x4c7   : > { %1033 = vxpose.xlu0.b32.cont [13/16] %v993_v29, 128 }
 0x4cf   : > { %1034 = vxpose.xlu0.b32.cont [14/16] %v996_v30, 128 }
 0x4d7   : > { %1035 = vxpose.xlu0.b32.cont [15/16] %v999_v31, 128 }
 0x4df   : > { %1036 = vxpose.xlu0.b32.end [16/16] %v1002_v32, 128 }
 0x50b   : > { %v1037_v33 = vpop.trf.xlu0 }
 0x50c   : > { %1053 = vst [vmem:[#allocation6] sm:$0xff] %v1037_v33 }
 0x513   : > { %v1038_v34 = vpop.trf.xlu0 }
 0x51b   : > { %v1039_v35 = vpop.trf.xlu0 }
 0x523   : > { %v1040_v36 = vpop.trf.xlu0 }
 0x52b   : > { %v1041_v37 = vpop.trf.xlu0 }
 0x533   : > { %v1042_v38 = vpop.trf.xlu0 }
 0x53b   : > { %v1043_v39 = vpop.trf.xlu0 }
 0x543   : > { %v1044_v40 = vpop.trf.xlu0 }
 0x54b   : > { %v1045_v41 = vpop.trf.xlu0 }
 0x553   : > { %v1046_v42 = vpop.trf.xlu0 }
 0x55b   : > { %v1047_v43 = vpop.trf.xlu0 }
 0x563   : > { %v1048_v44 = vpop.trf.xlu0 }
 0x56b   : > { %v1049_v45 = vpop.trf.xlu0 }
 0x573   : > { %v1050_v46 = vpop.trf.xlu0 }
 0x57b   : > { %v1051_v47 = vpop.trf.xlu0 }
 0x583   : > { %v1052_v48 = vpop.trf.xlu0 }
 0x584 PF: > { %v2256_v49 = vmov 2   ;;  %s1098_s18 = scalar_lea.vmem [#allocation5], %s2559_s23  ;;  %v2257_v53 = vmov 3   ;;  %v1069_v56 = vld [vmem:[%s365_s25] sm:$0xff]  ;;  %s2922_s22 = sld [smem:[#allocation27_spill]] }
 0x585   : > { %1902 = vset.pattern.permute.xlu1 %v2256_v49  ;;  %1900 = vset.pattern.permute.xlu0 %v2256_v49  ;;  %v1101_v50 = vld [vmem:[%s1098_s18 + $0x10] sm:$0xff]  ;;  %v1099_v51 = vld [vmem:[%s1098_s18] sm:$0xff]  ;;  %v1102_v52 = vld [vmem:[%s1098_s18 + $0x18] sm:$0xff]  ;;  %v1072_v57 = vunpack.c.2.s8 %v1069_v56  ;;  %v1070_v58 = vunpack.c.0.s8 %v1069_v56  ;;  %v1073_v4 = vunpack.c.3.s8 %v1069_v56  ;;  %v1071_v18 = vunpack.c.1.s8 %v1069_v56 }
 0x586   : > { %1118 = vperm.xlu0 %1900, %v1101_v50   ;;  %1108 = vperm.xlu1 %1902, %v1099_v51   ;;  %v1100_v54 = vld [vmem:[%s1098_s18 + $0x8] sm:$0xff]  ;;  %v1907_v60 = vld [vmem:[#allocation6] ss:$0 sm:$0xff]  ;;  %v1908_v9 = vld [vmem:[#allocation6 + $0x1] ss:$0 sm:$0xff] }
 0x587   : > { %1904 = vset.pattern.permute.xlu2 %v2256_v49  ;;  %v2667_v61 = vcvt.s32.f32 %v1072_v57  ;;  %v2669_v62 = vcvt.s32.f32 %v1070_v58  ;;  %v2677_v14 = vcvt.s32.f32 %v1073_v4  ;;  %v2680_v26 = vcvt.s32.f32 %v1071_v18  ;;  %v1097_v48 = vld [vmem:[#allocation4 + $0x28] sm:$0xff]  ;;  %v1094_v56 = vld [vmem:[#allocation4 + $0x60] sm:$0xff] }
 0x588   : > { %1123 = vperm.xlu2 %1904, %v1102_v52   ;;  %1200 = vmatpush.msra.mxu0 %v1097_v48 }
 0x589   : > { %vm1080_vm0 = vcmp.gt.f32.partialorder %v2667_v61, 0.0  ;;  %vm1078_vm1 = vcmp.gt.f32.partialorder %v2669_v62, 0.0  ;;  %vm1081_vm5 = vcmp.gt.f32.partialorder %v2677_v14, 0.0  ;;  %vm1079_vm9 = vcmp.gt.f32.partialorder %v2680_v26, 0.0  ;;  %1703 = vmatpush.msra.mxu2 %v1097_v48  ;;  %1328 = vmatpush.msra.mxu1 %v1097_v48  ;;  %v1087_v61 = vld [vmem:[#allocation4 + $0x68] sm:$0xff]  ;;  %v1082_v26 = vld [vmem:[#allocation4 + $0x30] sm:$0xff] }
 0x58a   : > { %1719 = vmatpush.msra.mxu3 %v1097_v48  ;;  %p1613_p1 = scmp.ne.s32.totalorder %s2922_s22, 0 }
 0x58b   : > { %s1388_s24 = scalar_lea.vmem (!%p1613_p1), [#allocation3], %s2559_s23 }
 0x58e   : > { %1901 = vset.pattern.permute.xlu0 %v2257_v53  ;;  %1903 = vset.pattern.permute.xlu1 %v2257_v53 }
 0x58f   : > { %1247 = vperm.xlu0 %1901, %v1101_v50   ;;  %1239 = vperm.xlu1 %1903, %v1099_v51   ;;  %v1095_v51 = vld [vmem:[#allocation4 + $0x70] sm:$0xff] }
 0x590   : > { %1905 = vset.pattern.permute.xlu2 %v2257_v53 }
 0x591   : > { %1251 = vperm.xlu2 %1905, %v1102_v52  }
 0x597   : > { %1906 = vset.pattern.permute.xlu1 %v2256_v49  ;;  %v1096_v49 = vld [vmem:[#allocation4 + $0x78] sm:$0xff] }
 0x598   : > { %1113 = vperm.xlu1 %1906, %v1100_v54   ;;  %1201 = vmatpush.msra.mxu0 %v1096_v49 }
 0x599   : > { %1243 = vperm.xlu2 %1905, %v1100_v54   ;;  %1704 = vmatpush.msra.mxu2 %v1096_v49 }
 0x59a   : > { %1329 = vmatpush.msra.mxu1 %v1096_v49  ;;  %1720 = vmatpush.msra.mxu3 %v1096_v49 }
 0x59b   : > { %1202 = vmatpush.msra.mxu0 %v1095_v51  ;;  %1705 = vmatpush.msra.mxu2 %v1095_v51 }
 0x59c   : > { %1330 = vmatpush.msra.mxu1 %v1095_v51  ;;  %1721 = vmatpush.msra.mxu3 %v1095_v51 }
 0x59d   : > { %1203 = vmatpush.msra.mxu0 %v1094_v56  ;;  %1706 = vmatpush.msra.mxu2 %v1094_v56 }
 0x59e   : > { %1331 = vmatpush.msra.mxu1 %v1094_v56  ;;  %1722 = vmatpush.msra.mxu3 %v1094_v56 }
 0x5e2   : > { %v1124_v55 = vpop.permute.xlu2 %1123 }
 0x5e3   : > { %v1130_v3 = vadd.f32 %v1907_v60, %v1124_v55 }
 0x5e5   : > { %v1138_v13 = vmul.f32 0.2, %v1130_v3  ;;  %vm1134_vm4 = vcmp.ge.f32.partialorder %v1130_v3, 0.0 }
 0x5e7   : > { %v1142_v22 = vsel %vm1134_vm4, %v1130_v3, %v1138_v13  ;;  %v1092_v3 = vld [vmem:[#allocation4 + $0x10] sm:$0xff] }
 0x5e8   : > { %v2684_v27 = vsel %vm1081_vm5, %v1142_v22, -1e+30 }
 0x5eb   : > { %v1252_v59 = vpop.permute.xlu2 %1251 }
 0x5ec   : > { %v1258_v21 = vadd.f32 %v1908_v9, %v1252_v59 }
 0x5ee   : > { %v1266_v32 = vmul.f32 0.2, %v1258_v21  ;;  %vm1262_vm10 = vcmp.ge.f32.partialorder %v1258_v21, 0.0 }
 0x5f0   : > { %v1270_v37 = vsel %vm1262_vm10, %v1258_v21, %v1266_v32  ;;  %v1088_v21 = vld [vmem:[#allocation4 + $0x8] sm:$0xff]  ;;  %v1084_v32 = vld [vmem:[#allocation4 + $0x58] sm:$0xff] }
 0x5f1   : > { %v2699_v39 = vsel %vm1081_vm5, %v1270_v37, -1e+30 }
 0x5f3   : > { %v1244_v12 = vpop.permute.xlu2 %1243 }
 0x5f4   : > { %v1256_v17 = vadd.f32 %v1908_v9, %v1244_v12 }
 0x5f6   : > { %v1264_v25 = vmul.f32 0.2, %v1256_v17  ;;  %vm1260_vm8 = vcmp.ge.f32.partialorder %v1256_v17, 0.0 }
 0x5f8   : > { %v1119_v63 = vpop.permute.xlu0 %1118  ;;  %v1109_v0 = vpop.permute.xlu1 %1108  ;;  %v1268_v33 = vsel %vm1260_vm8, %v1256_v17, %v1264_v25 }
 0x5f9   : > { %v1129_v1 = vadd.f32 %v1907_v60, %v1119_v63  ;;  %v1127_v2 = vadd.f32 %v1907_v60, %v1109_v0  ;;  %v2694_v36 = vsel %vm1079_vm9, %v1268_v33, -1e+30  ;;  %v1083_v33 = vld [vmem:[#allocation4] sm:$0xff] }
 0x5fb   : > { %v1137_v5 = vmul.f32 0.2, %v1129_v1  ;;  %v1135_v6 = vmul.f32 0.2, %v1127_v2  ;;  %vm1133_vm2 = vcmp.ge.f32.partialorder %v1129_v1, 0.0  ;;  %vm1131_vm3 = vcmp.ge.f32.partialorder %v1127_v2, 0.0 }
 0x5fd   : > { %v1141_v7 = vsel %vm1133_vm2, %v1129_v1, %v1137_v5  ;;  %v1139_v8 = vsel %vm1131_vm3, %v1127_v2, %v1135_v6  ;;  %v1093_v1 = vld [vmem:[#allocation4 + $0x38] sm:$0xff]  ;;  %v1091_v5 = vld [vmem:[#allocation4 + $0x20] sm:$0xff] }
 0x5fe   : > { %v1145_v10 = vsel %vm1080_vm0, %v1141_v7, -1e+30  ;;  %v1143_v11 = vsel %vm1078_vm1, %v1139_v8, -1e+30  ;;  %1204 = vmatpush.msra.mxu0 %v1093_v1  ;;  %1707 = vmatpush.msra.mxu2 %v1093_v1 }
 0x5ff   : > { %1151 = vmax.xlane.f32.xlu0 %v1145_v10  ;;  %1147 = vmax.xlane.f32.xlu2 %v1143_v11 }
 0x600   : > { %1205 = vmatpush.msra.mxu0 %v1092_v3  ;;  %1332 = vmatpush.msra.mxu1 %v1093_v1 }
 0x601   : > { %v1248_v15 = vpop.permute.xlu0 %1247  ;;  %v1240_v16 = vpop.permute.xlu1 %1239  ;;  %1708 = vmatpush.msra.mxu2 %v1092_v3  ;;  %1723 = vmatpush.msra.mxu3 %v1093_v1 }
 0x602   : > { %v1257_v19 = vadd.f32 %v1908_v9, %v1248_v15  ;;  %v1255_v20 = vadd.f32 %v1908_v9, %v1240_v16  ;;  %1206 = vmatpush.msra.mxu0 %v1091_v5  ;;  %1333 = vmatpush.msra.mxu1 %v1092_v3  ;;  %v1089_v16 = vld [vmem:[#allocation4 + $0x48] sm:$0xff] }
 0x603   : > { %1709 = vmatpush.msra.mxu2 %v1091_v5  ;;  %1724 = vmatpush.msra.mxu3 %v1092_v3 }
 0x604   : > { %v1265_v23 = vmul.f32 0.2, %v1257_v19  ;;  %v1263_v24 = vmul.f32 0.2, %v1255_v20  ;;  %vm1261_vm6 = vcmp.ge.f32.partialorder %v1257_v19, 0.0  ;;  %vm1259_vm7 = vcmp.ge.f32.partialorder %v1255_v20, 0.0  ;;  %1334 = vmatpush.msra.mxu1 %v1091_v5 }
 0x605   : > { %1725 = vmatpush.msra.mxu3 %v1091_v5 }
 0x606   : > { %v1269_v28 = vsel %vm1261_vm6, %v1257_v19, %v1265_v23  ;;  %v1267_v29 = vsel %vm1259_vm7, %v1255_v20, %v1263_v24 }
 0x607   : > { %1153 = vmax.xlane.f32.xlu0 %v2684_v27  ;;  %v1273_v30 = vsel %vm1080_vm0, %v1269_v28, -1e+30  ;;  %v1271_v31 = vsel %vm1078_vm1, %v1267_v29, -1e+30 }
 0x608   : > { %1279 = vmax.xlane.f32.xlu1 %v1273_v30  ;;  %1275 = vmax.xlane.f32.xlu2 %v1271_v31 }
 0x60a   : > { %v1114_v34 = vpop.permute.xlu1 %1113 }
 0x60b   : > { %v1128_v35 = vadd.f32 %v1907_v60, %v1114_v34 }
 0x60d   : > { %v1136_v38 = vmul.f32 0.2, %v1128_v35  ;;  %vm1132_vm11 = vcmp.ge.f32.partialorder %v1128_v35, 0.0 }
 0x60f   : > { %1277 = vmax.xlane.f32.xlu0 %v2694_v36  ;;  %v1140_v40 = vsel %vm1132_vm11, %v1128_v35, %v1136_v38 }
 0x610   : > { %1281 = vmax.xlane.f32.xlu1 %v2699_v39  ;;  %v2704_v41 = vsel %vm1079_vm9, %v1140_v40, -1e+30 }
 0x611   : > { %1149 = vmax.xlane.f32.xlu2 %v2704_v41 }
 0x672   : > { %v1152_v42 = vpop.xlane.xlu0 %1151  ;;  %v1148_v43 = vpop.xlane.xlu2 %1147 }
 0x673   : > { %v1157_v44 = vsub.f32 %v1145_v10, %v1152_v42  ;;  %v1155_v45 = vsub.f32 %v1143_v11, %v1148_v43  ;;  %v1090_v10 = vld [vmem:[#allocation4 + $0x40] sm:$0xff] }
 0x674   : > { %1207 = vmatpush.msra.mxu0 %v1090_v10  ;;  %1710 = vmatpush.msra.mxu2 %v1090_v10 }
 0x675   : > { %v1163_v46 = vmul.f32 1.442695, %v1157_v44  ;;  %v1159_v47 = vmul.f32 1.442695, %v1155_v45  ;;  %1335 = vmatpush.msra.mxu1 %v1090_v10  ;;  %1726 = vmatpush.msra.mxu3 %v1090_v10 }
 0x676   : > { %1208 = vmatpush.msra.mxu0 %v1089_v16  ;;  %1711 = vmatpush.msra.mxu2 %v1089_v16 }
 0x677   : > { %1910 = vpow2.f32 %v1163_v46  ;;  %1336 = vmatpush.msra.mxu1 %v1089_v16  ;;  %1727 = vmatpush.msra.mxu3 %v1089_v16 }
 0x678   : > { %1912 = vpow2.f32 %v1159_v47  ;;  %1209 = vmatpush.msra.mxu0 %v1088_v21  ;;  %1712 = vmatpush.msra.mxu2 %v1088_v21 }
 0x679   : > { %1337 = vmatpush.msra.mxu1 %v1088_v21  ;;  %1728 = vmatpush.msra.mxu3 %v1088_v21 }
 0x67a   : > { %v1154_v50 = vpop.xlane.xlu0 %1153  ;;  %1210 = vmatpush.msra.mxu0 %v1087_v61  ;;  %1713 = vmatpush.msra.mxu2 %v1087_v61 }
 0x67b   : > { %v1280_v52 = vpop.xlane.xlu1 %1279  ;;  %v1276_v53 = vpop.xlane.xlu2 %1275  ;;  %v1158_v59 = vsub.f32 %v2684_v27, %v1154_v50  ;;  %1338 = vmatpush.msra.mxu1 %v1087_v61  ;;  %1729 = vmatpush.msra.mxu3 %v1087_v61 }
 0x67c   : > { %v1285_v54 = vsub.f32 %v1273_v30, %v1280_v52  ;;  %v1283_v55 = vsub.f32 %v1271_v31, %v1276_v53  ;;  %v1086_v30 = vld [vmem:[#allocation4 + $0x50] sm:$0xff]  ;;  %v1085_v31 = vld [vmem:[#allocation4 + $0x18] sm:$0xff] }
 0x67d   : > { %v1911_v57 = vpop.eup %1910  ;;  %v1165_v4 = vmul.f32 1.442695, %v1158_v59  ;;  %1211 = vmatpush.msra.mxu0 %v1086_v30  ;;  %1714 = vmatpush.msra.mxu2 %v1086_v30 }
 0x67e   : > { %v1913_v58 = vpop.eup %1912  ;;  %v1291_v60 = vmul.f32 1.442695, %v1285_v54  ;;  %v1287_v63 = vmul.f32 1.442695, %v1283_v55  ;;  %v2710_v0 = vsel %vm1080_vm0, %v1911_v57, 0.0  ;;  %1339 = vmatpush.msra.mxu1 %v1086_v30  ;;  %1730 = vmatpush.msra.mxu3 %v1086_v30 }
 0x67f   : > { %1175 = vadd.xlane.f32.xlu1 %v2710_v0  ;;  %v2715_v2 = vsel %vm1078_vm1, %v1913_v58, 0.0  ;;  %1212 = vmatpush.msra.mxu0 %v1085_v31 }
 0x680   : > { %1914 = vpow2.f32 %v1291_v60  ;;  %1171 = vadd.xlane.f32.xlu0 %v2715_v2  ;;  %1715 = vmatpush.msra.mxu2 %v1085_v31 }
 0x681   : > { %1916 = vpow2.f32 %v1287_v63  ;;  %1340 = vmatpush.msra.mxu1 %v1085_v31  ;;  %1731 = vmatpush.msra.mxu3 %v1085_v31 }
 0x682   : > { %v1278_v6 = vpop.xlane.xlu0 %1277  ;;  %1918 = vpow2.f32 %v1165_v4  ;;  %1213 = vmatpush.msra.mxu0 %v1084_v32  ;;  %1716 = vmatpush.msra.mxu2 %v1084_v32  ;;  %v1103_v4 = vlaneseq }
 0x683   : > { %v1282_v7 = vpop.xlane.xlu1 %1281  ;;  %v1284_v13 = vsub.f32 %v2694_v36, %v1278_v6  ;;  %1341 = vmatpush.msra.mxu1 %v1084_v32  ;;  %1732 = vmatpush.msra.mxu3 %v1084_v32  ;;  %v2258_v6 = vmov 0.0  }
 0x684   : > { %v1286_v8 = vsub.f32 %v2699_v39, %v1282_v7  ;;  %v1150_v9 = vpop.xlane.xlu2 %1149  ;;  %1214 = vmatpush.msra.mxu0 %v1083_v33  ;;  %1717 = vmatpush.msra.mxu2 %v1083_v33  ;;  %v1104_v5 = vand.u32 127, %v1103_v4 }
 0x685   : > { %v1156_v11 = vsub.f32 %v2704_v41, %v1150_v9  ;;  %v1289_v22 = vmul.f32 1.442695, %v1284_v13  ;;  %1342 = vmatpush.msra.mxu1 %v1083_v33  ;;  %1733 = vmatpush.msra.mxu3 %v1083_v33  ;;  %v1909_v13 = vld [vmem:[%s437_s13] ss:$0 sm:$0xff] }
 0x686   : > { %v1915_v12 = vpop.eup %1914  ;;  %v1293_v15 = vmul.f32 1.442695, %v1286_v8  ;;  %1215 = vmatpush.msra.mxu0 %v1082_v26  ;;  %1718 = vmatpush.msra.mxu2 %v1082_v26  ;;  %vm1323_vm4 = vcmp.ge.s32.totalorder %v1104_v5, 4  ;;  %vm1196_vm6 = vcmp.lt.s32.totalorder %v1104_v5, 4 }
 0x687   : > { %v1917_v17 = vpop.eup %1916  ;;  %v1161_v18 = vmul.f32 1.442695, %v1156_v11  ;;  %v2723_v19 = vsel %vm1080_vm0, %v1915_v12, 0.0  ;;  %1343 = vmatpush.msra.mxu1 %v1082_v26  ;;  %1734 = vmatpush.msra.mxu3 %v1082_v26  ;;  %v1611_v7 = vsel %vm1196_vm6, 1.0, %v2258_v6 }
 0x688   : > { %1920 = vpow2.f32 %v1293_v15  ;;  %1303 = vadd.xlane.f32.xlu2 %v2723_v19  ;;  %v2728_v20 = vsel %vm1078_vm1, %v1917_v17, 0.0  ;;  %v1919_v23 = vpop.eup %1918 }
 0x689   : > { %1922 = vpow2.f32 %v1161_v18  ;;  %1299 = vadd.xlane.f32.xlu1 %v2728_v20  ;;  %v2733_v25 = vsel %vm1081_vm5, %v1919_v23, 0.0 }
 0x68a   : > { %1924 = vpow2.f32 %v1289_v22 }
 0x68e   : > { %v1921_v62 = vpop.eup %1920 }
 0x68f   : > { %v1923_v24 = vpop.eup %1922  ;;  %v2737_v27 = vsel %vm1081_vm5, %v1921_v62, 0.0  ;;  %vm1324_vm5 = vcmp.lt.s32.totalorder %v1104_v5, 8 }
 0x690   : > { %1177 = vadd.xlane.f32.xlu2 %v2733_v25  ;;  %1305 = vadd.xlane.f32.xlu0 %v2737_v27  ;;  %v2743_v28 = vsel %vm1079_vm9, %v1923_v24, 0.0  ;;  %v1925_v29 = vpop.eup %1924  ;;  %vm1325_vm7 = vmand %vm1323_vm4, %vm1324_vm5 }
 0x691   : > { %1173 = vadd.xlane.f32.xlu1 %v2743_v28  ;;  %v2748_v14 = vsel %vm1079_vm9, %v1925_v29, 0.0  ;;  %v1612_v9 = vsel %vm1325_vm7, 1.0, %v2258_v6 }
 0x698   : > { %1301 = vadd.xlane.f32.xlu2 %v2748_v14 }
 0x6f2   : > { %v1176_v34 = vpop.xlane.xlu1 %1175 }
 0x6f3   : > { %1926 = vrcp.f32 %v1176_v34  ;;  %v1172_v35 = vpop.xlane.xlu0 %1171  ;;  %vm1181_vm12 = vcmp.gt.f32.partialorder %v1176_v34, 0.0 }
 0x6f4   : > { %1928 = vrcp.f32 %v1172_v35  ;;  %vm1179_vm13 = vcmp.gt.f32.partialorder %v1172_v35, 0.0 }
 0x6f9   : > { %v1927_v36 = vpop.eup %1926 }
 0x6fa   : > { %v1929_v37 = vpop.eup %1928  ;;  %v1189_v38 = vsel %vm1181_vm12, %v1927_v36, 0.0 }
 0x6fb   : > { %v1304_v39 = vpop.xlane.xlu2 %1303  ;;  %v1187_v40 = vsel %vm1179_vm13, %v1929_v37, 0.0  ;;  %v1193_v41 = vmul.f32 %v1189_v38, %v2710_v0 }
 0x6fc   : > { %v1300_v42 = vpop.xlane.xlu1 %1299  ;;  %1930 = vrcp.f32 %v1304_v39  ;;  %v1191_v43 = vmul.f32 %v1187_v40, %v2715_v2  ;;  %vm1309_vm14 = vcmp.gt.f32.partialorder %v1304_v39, 0.0 }
 0x6fd   : > { %1932 = vrcp.f32 %v1300_v42  ;;  %1222 = vmatmul.f32.vlgmr.msra.gmra.mxu2 %v1193_v41  ;;  %vm1307_vm15 = vcmp.gt.f32.partialorder %v1300_v42, 0.0 }
 0x6fe   : > { %1216 = vmatmul.f32.vlgmr.msra.gmra.mxu0 %v1191_v43 }
 0x702   : > { %v1931_v44 = vpop.eup %1930 }
 0x703   : > { %v1933_v45 = vpop.eup %1932  ;;  %v1306_v46 = vpop.xlane.xlu0 %1305  ;;  %v1317_v48 = vsel %vm1309_vm14, %v1931_v44, 0.0 }
 0x704   : > { %v1178_v47 = vpop.xlane.xlu2 %1177  ;;  %1934 = vrcp.f32 %v1306_v46  ;;  %v1174_v49 = vpop.xlane.xlu1 %1173  ;;  %v1315_v50 = vsel %vm1307_vm15, %v1933_v45, 0.0  ;;  %v1321_v52 = vmul.f32 %v1317_v48, %v2723_v19  ;;  %vm1310_vm0 = vcmp.gt.f32.partialorder %v1306_v46, 0.0 }
 0x705   : > { %1936 = vrcp.f32 %v1178_v47  ;;  %v1319_v51 = vmul.f32 %v1315_v50, %v2728_v20  ;;  %vm1182_vm1 = vcmp.gt.f32.partialorder %v1178_v47, 0.0  ;;  %vm1180_vm2 = vcmp.gt.f32.partialorder %v1174_v49, 0.0 }
 0x706   : > { %1938 = vrcp.f32 %v1174_v49  ;;  %1350 = vmatmul.f32.vlgmr.msra.gmra.mxu3 %v1321_v52 }
 0x707   : > { %1344 = vmatmul.f32.vlgmr.msra.gmra.mxu1 %v1319_v51 }
 0x70a   : > { %v1935_v53 = vpop.eup %1934 }
 0x70b   : > { %v1937_v54 = vpop.eup %1936  ;;  %v1318_v55 = vsel %vm1310_vm0, %v1935_v53, 0.0 }
 0x70c   : > { %v1302_v56 = vpop.xlane.xlu2 %1301  ;;  %v1939_v57 = vpop.eup %1938  ;;  %v1190_v58 = vsel %vm1182_vm1, %v1937_v54, 0.0  ;;  %v1322_v59 = vmul.f32 %v1318_v55, %v2737_v27 }
 0x70d   : > { %1940 = vrcp.f32 %v1302_v56  ;;  %v1188_v60 = vsel %vm1180_vm2, %v1939_v57, 0.0  ;;  %v1194_v63 = vmul.f32 %v1190_v58, %v2733_v25  ;;  %vm1308_vm3 = vcmp.gt.f32.partialorder %v1302_v56, 0.0 }
 0x70e   : > { %v1192_v0 = vmul.f32 %v1188_v60, %v2743_v28  ;;  %1353 = vmatmul.f32.gmra.mxu3 %v1322_v59 }
 0x70f   : > { %1225 = vmatmul.f32.gmra.mxu2 %v1194_v63 }
 0x710   : > { %1219 = vmatmul.f32.gmra.mxu0 %v1192_v0 }
 0x713   : > { %v1941_v1 = vpop.eup %1940 }
 0x714   : > { %v1316_v2 = vsel %vm1308_vm3, %v1941_v1, 0.0 }
 0x715   : > { %v1320_v3 = vmul.f32 %v1316_v2, %v2748_v14 }
 0x717   : > { %1347 = vmatmul.f32.gmra.mxu1 %v1320_v3 }
 0x77b   : > { %v1217_v8 = vpop.f32.mrf.mxu0 }
 0x77c   : > { %v1229_v11 = vmul.f32 %v1611_v7, %v1217_v8 }
 0x780   : > { %v1223_v16 = vpop.f32.mrf.mxu2 }
 0x781   : > { %v1231_v19 = vmul.f32 %v1611_v7, %v1223_v16 }
 0x784   : > { %v1345_v10 = vpop.f32.mrf.mxu1 }
 0x785   : > { %v1357_v12 = vmul.f32 %v1612_v9, %v1345_v10 }
 0x787   : > { %v1361_v15 = vadd.f32 %v1357_v12, %v1229_v11 }
 0x789   : > { %v1369_v17 = vadd.f32 %v1909_v13, %v1361_v15  ;;  %v1351_v18 = vpop.f32.mrf.mxu3 }
 0x78a   : > { %v1359_v20 = vmul.f32 %v1612_v9, %v1351_v18 }
 0x78c   : > { %v1363_v21 = vadd.f32 %v1359_v20, %v1231_v19 }
 0x78d   : > { %v1220_v61 = vpop.f32.mrf.mxu0 }
 0x78e   : > { %v1371_v22 = vadd.f32 %v1909_v13, %v1363_v21  ;;  %v1230_v28 = vmul.f32 %v1611_v7, %v1220_v61 }
 0x791   : > { %v1354_v62 = vpop.f32.mrf.mxu3 }
 0x792   : > { %v1226_v23 = vpop.f32.mrf.mxu2  ;;  %v1360_v25 = vmul.f32 %v1612_v9, %v1354_v62 }
 0x793   : > { %v1232_v24 = vmul.f32 %v1611_v7, %v1226_v23 }
 0x794   : > { %v1348_v27 = vpop.f32.mrf.mxu1 }
 0x795   : > { %v1358_v29 = vmul.f32 %v1612_v9, %v1348_v27  ;;  %v1364_v14 = vadd.f32 %v1360_v25, %v1232_v24  ;;  %1375 = sbr.rel (%p1613_p1) target bundleno = 1953 (0x7a1), region = 80 }
 0x797   : > { %v1362_v30 = vadd.f32 %v1358_v29, %v1230_v28  ;;  %v1372_v31 = vadd.f32 %v1909_v13, %v1364_v14 }
 0x799   : > { %v1370_v32 = vadd.f32 %v1909_v13, %v1362_v30 }
 0x79a   : > { %vm1376_vm8 = vcmp.ge.f32.partialorder %v1369_v17, 0.0  ;;  %v1380_v33 = vmul.f32 0.01, %v1369_v17  ;;  %vm1378_vm10 = vcmp.ge.f32.partialorder %v1371_v22, 0.0  ;;  %v1382_v34 = vmul.f32 0.01, %v1371_v22 }
 0x79b   : > { %vm1377_vm9 = vcmp.ge.f32.partialorder %v1370_v32, 0.0  ;;  %v1381_v26 = vmul.f32 0.01, %v1370_v32  ;;  %vm1379_vm11 = vcmp.ge.f32.partialorder %v1372_v31, 0.0  ;;  %v1383_v36 = vmul.f32 0.01, %v1372_v31 }
 0x79c   : > { %v1384_v35 = vsel %vm1376_vm8, %v1369_v17, %v1380_v33  ;;  %v1386_v38 = vsel %vm1378_vm10, %v1371_v22, %v1382_v34 }
 0x79d   : > { %1389 = vst [vmem:[%s1388_s24] sm:$0xff] %v1384_v35  ;;  %v1385_v37 = vsel %vm1377_vm9, %v1370_v32, %v1381_v26  ;;  %v1387_v39 = vsel %vm1379_vm11, %v1372_v31, %v1383_v36 }
 0x79e   : > { %1390 = vst [vmem:[%s1388_s24 + $0x8] sm:$0xff] %v1385_v37 }
 0x79f   : > { %1391 = vst [vmem:[%s1388_s24 + $0x10] sm:$0xff] %v1386_v38 }
 0x7a0   : > { %1392 = vst [vmem:[%s1388_s24 + $0x18] sm:$0xff] %v1387_v39 }
 0x7a1 PF: > { %s2923_s10 = sld [smem:[#allocation27_spill]] }
 0x7a7   : > { %p1614_p3 = scmp.ne.s32.totalorder %s2923_s10, 1 }
 0x7a8   : > { %s1396_s7 = scalar_lea.vmem (!%p1614_p3), [#allocation2], %s2559_s23 }
 0x7a9   : > { %1395 = sbr.rel (%p1614_p3) target bundleno = 1973 (0x7b5), region = 84 }
 0x7ae   : > { %v1397_v40 = vld [vmem:[%s1396_s7] sm:$0xff]  ;;  %v1398_v41 = vld [vmem:[%s1396_s7 + $0x8] sm:$0xff]  ;;  %v1399_v42 = vld [vmem:[%s1396_s7 + $0x10] sm:$0xff] }
 0x7af   : > { %v1401_v43 = vadd.f32 %v1397_v40, %v1369_v17  ;;  %v1402_v44 = vadd.f32 %v1398_v41, %v1370_v32  ;;  %v1403_v45 = vadd.f32 %v1399_v42, %v1371_v22  ;;  %v1400_v46 = vld [vmem:[%s1396_s7 + $0x18] sm:$0xff] }
 0x7b0   : > { %v1404_v47 = vadd.f32 %v1400_v46, %v1372_v31 }
 0x7b1   : > { %1405 = vst [vmem:[%s2574_s16] sm:$0xff] %v1401_v43 }
 0x7b2   : > { %1406 = vst [vmem:[%s2574_s16 + $0x8] sm:$0xff] %v1402_v44 }
 0x7b3   : > { %1407 = vst [vmem:[%s2574_s16 + $0x10] sm:$0xff] %v1403_v45 }
 0x7b4   : > { %1408 = vst [vmem:[%s2574_s16 + $0x18] sm:$0xff] %v1404_v47 }
 0x7b5 PF: > { %s2924_s30 = sld [smem:[#allocation27_spill]]  ;;  %s1423_s23 = sshll.u32 %s2574_s16, 4  ;;  %s1424_s23 = int_to_ptr.vmem [resolvable:$true] %s1423_s23 }
 0x7b6   : > { %s2925_s6 = sld [smem:[#allocation26_spill]]  ;;  %s1410_s19 = scalar_lea.sflag [#allocation9], %s432_s15 }
 0x7b7   : > { %s2928_s4 = sld [smem:[#allocation42_spill]] }
 0x7bc   : > { %s1417_s3 = smul.u32 %s2925_s6, %s2924_s30 }
 0x7bd   : > { %s2112_s16 = scalar_lea.hbm %s2928_s4, 128 }
 0x7be   : > { %s1622_s13 = sshll.u32 %s1417_s3, 5 }
 0x7bf   : > { %s1422_s8 = scalar_lea.hbm %s2928_s4, %s1622_s13 }
 0x7c0   : > { %s1425_s11 = sshll.u32 %s1422_s8, 4  ;;  %s1426_s11 = int_to_ptr.hbm [resolvable:$true] %s1425_s11 }
 0x7c1   : > { %s2106_s18 = sshra.s32 %s1426_s11, 4  ;;  %s2107_s18 = int_to_ptr.hbm [resolvable:$true] %s2106_s18 }
 0x7c2   : > { %s2108_s27 = scalar_lea.hbm %s2107_s18, 32  ;;  %p2113_p11 = scmp.lt.s32.totalorder %s2107_s18, %s2928_s4 }
 0x7c3   : > { %p2109_p7 = scmp.ne.s32.totalorder %s2107_s18, %s2108_s27  ;;  %p2114_p0 = scmp.lt.s32.totalorder %s2112_s16, %s2108_s27 }
 0x7c5   : > { %p2110_p12 = pnand %p2109_p7, %p2382_p6  ;;  %p2115_p9 = por %p2114_p0, %p2113_p11 }
 0x7c7   : > { %p2111_p10 = pneg %p2110_p12 }
 0x7c9   : > { %p2116_p2 = pnand %p2115_p9, %p2111_p10 }
 0x7cb   : > { %2119 = shalt.err (!%p2116_p2)
}
 0x7cc   : > { %s2259_s15 = smov 128   ;;  %s2260_s10 = smov 8  }
 0x7cd   : > { %1749 = dma.vmem_to_hbm [thread:$0]  (%p2382_p6), %s1424_s23, 512, %s1426_s11, %s1410_s19, %s2259_s15, %s2259_s15, %s2260_s10  }
 0x7ce PF: > { %s2929_s7 = sld [smem:[#allocation22_spill]]  ;;  %p1777_p4 = scmp.ge.s32.totalorder %s2250_s14, 2 }
 0x7d0   : > { %p1769_p5 = pnand %p1777_p4, %p2387_p8 }
 0x7d2   : > { %p1770_p13 = pneg %p1769_p5 }
 0x7d4   : > { %s1440_s6 = sand.u32 1, %s2929_s7  }
 0x7d5   : > { %s1441_s17 = scalar_lea.sflag [#allocation9], %s1440_s6 }
 0x7d6   : > { %2193 = dma.done.wait (%p1770_p13), %s1441_s17, 512  }
 0x7d7   : > { %2195 = vsyncadd (%p1770_p13), %s1441_s17, 4294966784  ;;  %s27_s14 = sadd.s32 1, %s2250_s14   ;;  %s2932_s24 = sld [smem:[#allocation23_spill]] }
 0x7d8   : > { %p2795_p1 = scmp.ge.s32.totalorder %s27_s14, 10   ;;  %s2933_s27 = sld [smem:[#allocation24_spill]] }
 0x7d9   : > { %s2934_s30 = sld [smem:[#allocation25_spill]]  ;;  %s2939_s25 = smov %s2206_s26 }
 0x7da   : > { %s2935_s5 = sld [smem:[#allocation34_spill]]  ;;  %s2940_s26 = smov %s2508_s28 }
 0x7db   : > { %s2936_s11 = sld [smem:[#allocation28_spill]]  ;;  %s2941_s28 = smov %s2218_s29 }
 0x7dc   : > { %s2937_s23 = sld [smem:[#allocation32_spill]]  ;;  %s2942_s29 = smov %s2503_s0 }
 0x7dd   : > { %s2938_s13 = sld [smem:[#allocation33_spill]]  ;;  %s2943_s8 = smov %s2230_s9 }
 0x7de   : > { %s2945_s10 = smov %s2242_s12  ;;  %26 = sbr.rel (!%p2795_p1) target bundleno = 21 (0x15), region = 148 }
 0x7e0   : > { %s2944_s9 = smov %s2935_s5 }
 0x7e2   : > { %s2946_s12 = smov %s2937_s23 }
 0x7e3   :  { %1447 = vsyncpa [#allocation8], 1 }
 0x7e4   :  { %1449 = vsyncpa [#allocation8 + $0x1], 1 }
 0x7e5   :  { %1450 = vsyncpa [#allocation11], 1 }
 0x7e6   :  { %1452 = vsyncpa [#allocation11 + $0x1], 1 }
 0x7e7   :  { %1453 = vsyncpa [#allocation14], 1 }
 0x7e8   :  { %1455 = vsyncpa [#allocation14 + $0x1], 1 }
 0x7e9   :  { %1456 = vsyncpa [#allocation9], 1 }
 0x7ea   :  { %1458 = vsyncpa [#allocation9 + $0x1], 1 }

</bundles_post_ra>
